<compile_context>
chip_gen: v7x
topology: tpu7x:2x2x1
jax: 0.10.0
libtpu: 0.0.40
codegen_flags: <defaults>
</compile_context>

<pallas_src>
import jax
import jax.numpy as jnp
from jax import lax
from jax.experimental import pallas as pl
from jax.experimental.pallas import tpu as pltpu

# ---- model dims implied by the module ---------------------------------------
L1 = 40            # input length (32*10 == fc1 in_features  =>  L1/4 == 10)
L2 = L1 // 2       # after pool1
L3 = L2 // 2       # after pool2
C1, C2 = 16, 32    # conv channels
HID, NCLS = 64, 10
NCLS_PAD = 128     # lane-dense output width

BBLK = 8           # batch rows per grid step
ROWS = BBLK * L1   # sublane rows in one grid-step block


# ---- in-kernel helpers -------------------------------------------------------
def _shift_prev(x, n):
    """out[r] = x[r - n] for r >= n else 0 (previous length step, zero pad)."""
    zeros = jnp.zeros((n, x.shape[1]), x.dtype)
    return jnp.concatenate([zeros, x[: x.shape[0] - n, :]], axis=0)


def _shift_next(x, n):
    """out[r] = x[r + n] for r < R - n else 0 (next length step, zero pad)."""
    zeros = jnp.zeros((n, x.shape[1]), x.dtype)
    return jnp.concatenate([x[n:, :], zeros], axis=0)


# ---- Pallas kernel -----------------------------------------------------------
def audionet_kernel(x_ref, w2_ref, wfc1_ref, slab_ref, o_ref):
    dot = lambda a, b: jnp.dot(a, b, preferred_element_type=jnp.float32)

    # Packed small constants: one (8,128) vreg load, static value slices.
    consts = slab_ref[0:8, :]
    w1_0 = consts[0:1, 0:C1]
    w1_1 = consts[1:2, 0:C1]
    w1_2 = consts[2:3, 0:C1]
    b1   = consts[3:4, 0:C1]
    b2   = consts[4:5, 0:C2]
    bfc1 = consts[5:6, 0:HID]
    bfc2 = consts[6:7, :]                     # (1, NCLS_PAD), zero past NCLS
    wfc2 = slab_ref[8:8 + HID, :]             # (HID, NCLS_PAD), zero past NCLS

    x = x_ref[...]                            # (ROWS, 1), row = l*BBLK + b
    xb = jnp.broadcast_to(x, (ROWS, C1))      # one lane splat, shifted below

    # conv1 (1 -> C1, k=3, pad=1) + relu; pool1's 0.5 pre-folded into w1/b1.
    y1 = jnp.maximum(
        _shift_prev(xb, BBLK) * w1_0 + xb * w1_1 + _shift_next(xb, BBLK) * w1_2 + b1,
        0.0)                                  # (ROWS, C1)

    # pool1 (avg k=2) as a pairwise VPU add: even-l rows hold the pooled value.
    s1 = y1 + _shift_next(y1, BBLK)

    # conv2 (C1 -> C2, k=3, pad=1) on the pooled grid (neighbor stride 2*BBLK):
    # im2row (lane concat of the 3 taps) + ONE matmul.  Odd-l rows are garbage
    # but are never read downstream.
    ys = jnp.concatenate(
        [_shift_prev(s1, 2 * BBLK), s1, _shift_next(s1, 2 * BBLK)], axis=1)   # (ROWS, 3*C1)
    y2 = jnp.maximum(dot(ys, w2_ref[...]) + b2, 0.0)                          # (ROWS, C2)

    # pool2 folded into the flatten (0.5 folded into wfc1 rows):
    # F[b, l*C2 + c] = y2[row 4*l] + y2[row 4*l + 2]
    pieces = [y2[(4 * l) * BBLK:(4 * l + 1) * BBLK, :]
              + y2[(4 * l + 2) * BBLK:(4 * l + 3) * BBLK, :]
              for l in range(L3)]
    f = jnp.concatenate(pieces, axis=1)                                       # (BBLK, L3*C2)

    # fc1 + relu, fc2 — lane-dense (BBLK, NCLS_PAD) output store.
    h = jnp.maximum(dot(f, wfc1_ref[...]) + bfc1, 0.0)                        # (BBLK, HID)
    o_ref[...] = dot(h, wfc2) + bfc2                                          # (BBLK, NCLS_PAD)


# ---- wrapper -----------------------------------------------------------------
def audionet_forward(x_ncw, params):
    """x_ncw: (BT, 1, L1) float32, PyTorch NCW layout; BT must be a multiple of BBLK."""
    w1, b1, w2, b2, wfc1, bfc1, wfc2, bfc2 = params
    f32 = jnp.float32
    BT = x_ncw.shape[0]
    assert BT % BBLK == 0, "batch must be a multiple of BBLK"
    NB = BT // BBLK

    # input: block g holds batches [g*BBLK, (g+1)*BBLK), rows interleaved l*BBLK + b
    x_k = jnp.transpose(x_ncw.reshape(NB, BBLK, L1), (0, 2, 1)).reshape(NB * ROWS, 1)

    # conv2 weight flattened to im2row order: row = k*C1 + c1
    w2_k = jnp.transpose(w2, (2, 1, 0)).reshape(3 * C1, C2).astype(f32)
    # fc1 weight permuted to the kernel's l*C2+c flatten order; pool2's 0.5 folded in
    wfc1_k = 0.5 * jnp.transpose(wfc1.T.reshape(C2, L3, HID), (1, 0, 2)).reshape(L3 * C2, HID)

    # one lane-dense slab for every tiny constant + the (padded) fc2 weight
    slab = jnp.zeros((8 + HID, NCLS_PAD), f32)
    slab = slab.at[0, :C1].set(0.5 * w1[:, 0, 0])   # pool1's 0.5 folded (relu pos.-homogeneous)
    slab = slab.at[1, :C1].set(0.5 * w1[:, 0, 1])
    slab = slab.at[2, :C1].set(0.5 * w1[:, 0, 2])
    slab = slab.at[3, :C1].set(0.5 * b1)
    slab = slab.at[4, :C2].set(b2)
    slab = slab.at[5, :HID].set(bfc1)
    slab = slab.at[6, :NCLS].set(bfc2)
    slab = slab.at[8:8 + HID, :NCLS].set(wfc2.T)

    def const_spec(shape):
        return pl.BlockSpec(shape, lambda g, _n=len(shape): (0,) * _n)

    out = pl.pallas_call(
        audionet_kernel,
        out_shape=jax.ShapeDtypeStruct((BT, NCLS_PAD), f32),
        grid=(NB,),
        in_specs=[
            pl.BlockSpec((ROWS, 1), lambda g: (g, 0)),          # x tile per grid step
            const_spec((3 * C1, C2)),                           # w2 (resident)
            const_spec((L3 * C2, HID)),                         # wfc1 (resident)
            const_spec((8 + HID, NCLS_PAD)),                    # packed consts + wfc2 (resident)
        ],
        out_specs=pl.BlockSpec((BBLK, NCLS_PAD), lambda g: (g, 0)),
        compiler_params=pltpu.CompilerParams(
            dimension_semantics=("parallel",)),
    )(x_k, w2_k, wfc1_k, slab)
    return out[:, :NCLS]


# ---- pure-JAX reference (float version of the PyTorch forward) ----------------
def ref_forward(x_ncw, params):
    w1, b1, w2, b2, wfc1, bfc1, wfc2, bfc2 = params
    dn = ('NCH', 'OIH', 'NCH')
    x = lax.conv_general_dilated(x_ncw, w1, (1,), [(1, 1)], dimension_numbers=dn)
    x = jnp.maximum(x + b1[None, :, None], 0.0)
    x = x.reshape(x.shape[0], C1, L2, 2).mean(-1)
    x = lax.conv_general_dilated(x, w2, (1,), [(1, 1)], dimension_numbers=dn)
    x = jnp.maximum(x + b2[None, :, None], 0.0)
    x = x.reshape(x.shape[0], C2, L3, 2).mean(-1)
    x = x.reshape(x.shape[0], -1)                 # channel-major flatten (c*10 + l)
    x = jnp.maximum(x @ wfc1.T + bfc1, 0.0)
    return x @ wfc2.T + bfc2


if __name__ == "__main__":
    key = jax.random.PRNGKey(0)
    ks = jax.random.split(key, 9)
    scale = 0.1
    # deterministic synthetic parameters at PyTorch shapes
    w1 = scale * jax.random.normal(ks[0], (C1, 1, 3), jnp.float32)
    b1 = scale * jax.random.normal(ks[1], (C1,), jnp.float32)
    w2 = scale * jax.random.normal(ks[2], (C2, C1, 3), jnp.float32)
    b2 = scale * jax.random.normal(ks[3], (C2,), jnp.float32)
    wfc1 = scale * jax.random.normal(ks[4], (HID, C2 * L3), jnp.float32)
    bfc1 = scale * jax.random.normal(ks[5], (HID,), jnp.float32)
    wfc2 = scale * jax.random.normal(ks[6], (NCLS, HID), jnp.float32)
    bfc2 = scale * jax.random.normal(ks[7], (NCLS,), jnp.float32)
    params = (w1, b1, w2, b2, wfc1, bfc1, wfc2, bfc2)

    BT = 16                                            # frames batched per call
    x = jax.random.normal(ks[8], (BT, 1, L1), jnp.float32)   # PyTorch NCW input

    out = jax.block_until_ready(audionet_forward(x, params))

    ref = ref_forward(x, params)
    assert out.shape == (BT, NCLS)
    assert jnp.allclose(out, ref, rtol=1e-4, atol=1e-4), (out, ref)
    print("KERNEL_OK")
</pallas_src>

<mosaic_0001>
module attributes {stable_mosaic.version = 11 : i64} {
  func.func @audionet_kernel(%arg0: i32, %arg1: memref<320x1xf32, #tpu.memory_space<vmem>>, %arg2: memref<48x32xf32, #tpu.memory_space<vmem>>, %arg3: memref<320x64xf32, #tpu.memory_space<vmem>>, %arg4: memref<72x128xf32, #tpu.memory_space<vmem>>, %arg5: memref<8x128xf32, #tpu.memory_space<vmem>>) attributes {dimension_semantics = [#tpu.dimension_semantics<parallel>], iteration_bounds = array<i64: 2>, scalar_prefetch = 0 : i64, scratch_operands = 0 : i64, tpu.core_type = #tpu.core_type<tc>, window_params = [{transform_indices = @transform_0, window_bounds = array<i64: 320, 1>}, {pipeline_mode = #tpu.pipeline_mode<synchronous>, transform_indices = @transform_1, window_bounds = array<i64: 48, 32>}, {pipeline_mode = #tpu.pipeline_mode<synchronous>, transform_indices = @transform_2, window_bounds = array<i64: 320, 64>}, {pipeline_mode = #tpu.pipeline_mode<synchronous>, transform_indices = @transform_3, window_bounds = array<i64: 72, 128>}, {transform_indices = @transform_4, window_bounds = array<i64: 8, 128>}]} {
    %c0 = arith.constant 0 : index
    %c0_0 = arith.constant 0 : index
    %0 = vector.load %arg4[%c0, %c0_0] : memref<72x128xf32, #tpu.memory_space<vmem>>, vector<8x128xf32>
    %1 = vector.extract_strided_slice %0 {offsets = [0, 0], sizes = [1, 16], strides = [1, 1]} : vector<8x128xf32> to vector<1x16xf32>
    %2 = vector.extract_strided_slice %0 {offsets = [1, 0], sizes = [1, 16], strides = [1, 1]} : vector<8x128xf32> to vector<1x16xf32>
    %3 = vector.extract_strided_slice %0 {offsets = [2, 0], sizes = [1, 16], strides = [1, 1]} : vector<8x128xf32> to vector<1x16xf32>
    %4 = vector.extract_strided_slice %0 {offsets = [3, 0], sizes = [1, 16], strides = [1, 1]} : vector<8x128xf32> to vector<1x16xf32>
    %5 = vector.extract_strided_slice %0 {offsets = [4, 0], sizes = [1, 32], strides = [1, 1]} : vector<8x128xf32> to vector<1x32xf32>
    %6 = vector.extract_strided_slice %0 {offsets = [5, 0], sizes = [1, 64], strides = [1, 1]} : vector<8x128xf32> to vector<1x64xf32>
    %7 = vector.extract_strided_slice %0 {offsets = [6, 0], sizes = [1, 128], strides = [1, 1]} : vector<8x128xf32> to vector<1x128xf32>
    %c8 = arith.constant 8 : index
    %c0_1 = arith.constant 0 : index
    %8 = vector.load %arg4[%c8, %c0_1] : memref<72x128xf32, #tpu.memory_space<vmem>>, vector<64x128xf32>
    %c0_2 = arith.constant 0 : index
    %c0_3 = arith.constant 0 : index
    %9 = vector.load %arg1[%c0_2, %c0_3] : memref<320x1xf32, #tpu.memory_space<vmem>>, vector<320x1xf32>
    %10 = vector.shape_cast %9 : vector<320x1xf32> to vector<320x1xf32>
    %11 = vector.broadcast %10 : vector<320x1xf32> to vector<320x16xf32>
    %cst = arith.constant 0.000000e+00 : f32
    %12 = vector.broadcast %cst : f32 to vector<8x16xf32>
    %13 = vector.extract_strided_slice %11 {offsets = [0, 0], sizes = [312, 16], strides = [1, 1]} : vector<320x16xf32> to vector<312x16xf32>
    %14 = tpu.concatenate %12, %13 in 0 : vector<8x16xf32>, vector<312x16xf32> -> vector<320x16xf32>
    %15 = vector.broadcast %1 : vector<1x16xf32> to vector<320x16xf32>
    %16 = arith.mulf %14, %15 : vector<320x16xf32>
    %17 = vector.broadcast %2 : vector<1x16xf32> to vector<320x16xf32>
    %18 = arith.mulf %11, %17 : vector<320x16xf32>
    %19 = arith.addf %16, %18 : vector<320x16xf32>
    %cst_4 = arith.constant 0.000000e+00 : f32
    %20 = vector.broadcast %cst_4 : f32 to vector<8x16xf32>
    %21 = vector.extract_strided_slice %11 {offsets = [8, 0], sizes = [312, 16], strides = [1, 1]} : vector<320x16xf32> to vector<312x16xf32>
    %22 = tpu.concatenate %21, %20 in 0 : vector<312x16xf32>, vector<8x16xf32> -> vector<320x16xf32>
    %23 = vector.broadcast %3 : vector<1x16xf32> to vector<320x16xf32>
    %24 = arith.mulf %22, %23 : vector<320x16xf32>
    %25 = arith.addf %19, %24 : vector<320x16xf32>
    %26 = vector.broadcast %4 : vector<1x16xf32> to vector<320x16xf32>
    %27 = arith.addf %25, %26 : vector<320x16xf32>
    %cst_5 = arith.constant 0.000000e+00 : f32
    %28 = vector.broadcast %cst_5 : f32 to vector<320x16xf32>
    %29 = arith.maximumf %27, %28 : vector<320x16xf32>
    %cst_6 = arith.constant 0.000000e+00 : f32
    %30 = vector.broadcast %cst_6 : f32 to vector<8x16xf32>
    %31 = vector.extract_strided_slice %29 {offsets = [8, 0], sizes = [312, 16], strides = [1, 1]} : vector<320x16xf32> to vector<312x16xf32>
    %32 = tpu.concatenate %31, %30 in 0 : vector<312x16xf32>, vector<8x16xf32> -> vector<320x16xf32>
    %33 = arith.addf %29, %32 : vector<320x16xf32>
    %cst_7 = arith.constant 0.000000e+00 : f32
    %34 = vector.broadcast %cst_7 : f32 to vector<16x16xf32>
    %35 = vector.extract_strided_slice %33 {offsets = [0, 0], sizes = [304, 16], strides = [1, 1]} : vector<320x16xf32> to vector<304x16xf32>
    %36 = tpu.concatenate %34, %35 in 0 : vector<16x16xf32>, vector<304x16xf32> -> vector<320x16xf32>
    %cst_8 = arith.constant 0.000000e+00 : f32
    %37 = vector.broadcast %cst_8 : f32 to vector<16x16xf32>
    %38 = vector.extract_strided_slice %33 {offsets = [16, 0], sizes = [304, 16], strides = [1, 1]} : vector<320x16xf32> to vector<304x16xf32>
    %39 = tpu.concatenate %38, %37 in 0 : vector<304x16xf32>, vector<16x16xf32> -> vector<320x16xf32>
    %40 = tpu.concatenate %36, %33, %39 in 1 : vector<320x16xf32>, vector<320x16xf32>, vector<320x16xf32> -> vector<320x48xf32>
    %c0_9 = arith.constant 0 : index
    %c0_10 = arith.constant 0 : index
    %41 = vector.load %arg2[%c0_9, %c0_10] : memref<48x32xf32, #tpu.memory_space<vmem>>, vector<48x32xf32>
    %cst_11 = arith.constant dense<0.000000e+00> : vector<320x32xf32>
    %42 = tpu.matmul %40, %41, %cst_11 {dimension_numbers = #tpu.dot_dimension_numbers<[1], [0], [0], [1], [0, 0, 1, 1], [], []>} : vector<320x48xf32>, vector<48x32xf32>, vector<320x32xf32> -> vector<320x32xf32>
    %43 = vector.broadcast %5 : vector<1x32xf32> to vector<320x32xf32>
    %44 = arith.addf %42, %43 : vector<320x32xf32>
    %cst_12 = arith.constant 0.000000e+00 : f32
    %45 = vector.broadcast %cst_12 : f32 to vector<320x32xf32>
    %46 = arith.maximumf %44, %45 : vector<320x32xf32>
    %47 = vector.extract_strided_slice %46 {offsets = [0, 0], sizes = [8, 32], strides = [1, 1]} : vector<320x32xf32> to vector<8x32xf32>
    %48 = vector.extract_strided_slice %46 {offsets = [16, 0], sizes = [8, 32], strides = [1, 1]} : vector<320x32xf32> to vector<8x32xf32>
    %49 = arith.addf %47, %48 : vector<8x32xf32>
    %50 = vector.extract_strided_slice %46 {offsets = [32, 0], sizes = [8, 32], strides = [1, 1]} : vector<320x32xf32> to vector<8x32xf32>
    %51 = vector.extract_strided_slice %46 {offsets = [48, 0], sizes = [8, 32], strides = [1, 1]} : vector<320x32xf32> to vector<8x32xf32>
    %52 = arith.addf %50, %51 : vector<8x32xf32>
    %53 = vector.extract_strided_slice %46 {offsets = [64, 0], sizes = [8, 32], strides = [1, 1]} : vector<320x32xf32> to vector<8x32xf32>
    %54 = vector.extract_strided_slice %46 {offsets = [80, 0], sizes = [8, 32], strides = [1, 1]} : vector<320x32xf32> to vector<8x32xf32>
    %55 = arith.addf %53, %54 : vector<8x32xf32>
    %56 = vector.extract_strided_slice %46 {offsets = [96, 0], sizes = [8, 32], strides = [1, 1]} : vector<320x32xf32> to vector<8x32xf32>
    %57 = vector.extract_strided_slice %46 {offsets = [112, 0], sizes = [8, 32], strides = [1, 1]} : vector<320x32xf32> to vector<8x32xf32>
    %58 = arith.addf %56, %57 : vector<8x32xf32>
    %59 = vector.extract_strided_slice %46 {offsets = [128, 0], sizes = [8, 32], strides = [1, 1]} : vector<320x32xf32> to vector<8x32xf32>
    %60 = vector.extract_strided_slice %46 {offsets = [144, 0], sizes = [8, 32], strides = [1, 1]} : vector<320x32xf32> to vector<8x32xf32>
    %61 = arith.addf %59, %60 : vector<8x32xf32>
    %62 = vector.extract_strided_slice %46 {offsets = [160, 0], sizes = [8, 32], strides = [1, 1]} : vector<320x32xf32> to vector<8x32xf32>
    %63 = vector.extract_strided_slice %46 {offsets = [176, 0], sizes = [8, 32], strides = [1, 1]} : vector<320x32xf32> to vector<8x32xf32>
    %64 = arith.addf %62, %63 : vector<8x32xf32>
    %65 = vector.extract_strided_slice %46 {offsets = [192, 0], sizes = [8, 32], strides = [1, 1]} : vector<320x32xf32> to vector<8x32xf32>
    %66 = vector.extract_strided_slice %46 {offsets = [208, 0], sizes = [8, 32], strides = [1, 1]} : vector<320x32xf32> to vector<8x32xf32>
    %67 = arith.addf %65, %66 : vector<8x32xf32>
    %68 = vector.extract_strided_slice %46 {offsets = [224, 0], sizes = [8, 32], strides = [1, 1]} : vector<320x32xf32> to vector<8x32xf32>
    %69 = vector.extract_strided_slice %46 {offsets = [240, 0], sizes = [8, 32], strides = [1, 1]} : vector<320x32xf32> to vector<8x32xf32>
    %70 = arith.addf %68, %69 : vector<8x32xf32>
    %71 = vector.extract_strided_slice %46 {offsets = [256, 0], sizes = [8, 32], strides = [1, 1]} : vector<320x32xf32> to vector<8x32xf32>
    %72 = vector.extract_strided_slice %46 {offsets = [272, 0], sizes = [8, 32], strides = [1, 1]} : vector<320x32xf32> to vector<8x32xf32>
    %73 = arith.addf %71, %72 : vector<8x32xf32>
    %74 = vector.extract_strided_slice %46 {offsets = [288, 0], sizes = [8, 32], strides = [1, 1]} : vector<320x32xf32> to vector<8x32xf32>
    %75 = vector.extract_strided_slice %46 {offsets = [304, 0], sizes = [8, 32], strides = [1, 1]} : vector<320x32xf32> to vector<8x32xf32>
    %76 = arith.addf %74, %75 : vector<8x32xf32>
    %77 = tpu.concatenate %49, %52, %55, %58, %61, %64, %67, %70, %73, %76 in 1 : vector<8x32xf32>, vector<8x32xf32>, vector<8x32xf32>, vector<8x32xf32>, vector<8x32xf32>, vector<8x32xf32>, vector<8x32xf32>, vector<8x32xf32>, vector<8x32xf32>, vector<8x32xf32> -> vector<8x320xf32>
    %c0_13 = arith.constant 0 : index
    %c0_14 = arith.constant 0 : index
    %78 = vector.load %arg3[%c0_13, %c0_14] : memref<320x64xf32, #tpu.memory_space<vmem>>, vector<320x64xf32>
    %cst_15 = arith.constant dense<0.000000e+00> : vector<8x64xf32>
    %79 = tpu.matmul %77, %78, %cst_15 {dimension_numbers = #tpu.dot_dimension_numbers<[1], [0], [0], [1], [0, 0, 1, 1], [], []>} : vector<8x320xf32>, vector<320x64xf32>, vector<8x64xf32> -> vector<8x64xf32>
    %80 = vector.broadcast %6 : vector<1x64xf32> to vector<8x64xf32>
    %81 = arith.addf %79, %80 : vector<8x64xf32>
    %cst_16 = arith.constant 0.000000e+00 : f32
    %82 = vector.broadcast %cst_16 : f32 to vector<8x64xf32>
    %83 = arith.maximumf %81, %82 : vector<8x64xf32>
    %cst_17 = arith.constant dense<0.000000e+00> : vector<8x128xf32>
    %84 = tpu.matmul %83, %8, %cst_17 {dimension_numbers = #tpu.dot_dimension_numbers<[1], [0], [0], [1], [0, 0, 1, 1], [], []>} : vector<8x64xf32>, vector<64x128xf32>, vector<8x128xf32> -> vector<8x128xf32>
    %85 = vector.broadcast %7 : vector<1x128xf32> to vector<8x128xf32>
    %86 = arith.addf %84, %85 : vector<8x128xf32>
    %c0_18 = arith.constant 0 : index
    %c0_19 = arith.constant 0 : index
    %87 = vector.load %arg5[%c0_18, %c0_19] : memref<8x128xf32, #tpu.memory_space<vmem>>, vector<8x128xf32>
    tpu.vector_store %arg5[%c0_18, %c0_19], %86 {strides = array<i32>} : memref<8x128xf32, #tpu.memory_space<vmem>>, vector<8x128xf32>,
    return
  }
  func.func @transform_0(%arg0: i32) -> (i32, i32) {
    %c0_i32 = arith.constant 0 : i32
    %c0_i32_0 = arith.constant 0 : i32
    return %arg0, %c0_i32 : i32, i32
  }
  func.func @transform_1(%arg0: i32) -> (i32, i32) {
    %c0_i32 = arith.constant 0 : i32
    %c0_i32_0 = arith.constant 0 : i32
    %c0_i32_1 = arith.constant 0 : i32
    return %c0_i32, %c0_i32_0 : i32, i32
  }
  func.func @transform_2(%arg0: i32) -> (i32, i32) {
    %c0_i32 = arith.constant 0 : i32
    %c0_i32_0 = arith.constant 0 : i32
    %c0_i32_1 = arith.constant 0 : i32
    return %c0_i32, %c0_i32_0 : i32, i32
  }
  func.func @transform_3(%arg0: i32) -> (i32, i32) {
    %c0_i32 = arith.constant 0 : i32
    %c0_i32_0 = arith.constant 0 : i32
    %c0_i32_1 = arith.constant 0 : i32
    return %c0_i32, %c0_i32_0 : i32, i32
  }
  func.func @transform_4(%arg0: i32) -> (i32, i32) {
    %c0_i32 = arith.constant 0 : i32
    %c0_i32_0 = arith.constant 0 : i32
    return %arg0, %c0_i32 : i32, i32
  }
}

</mosaic_0001>

<bundles_post_ra>
// kernel: tpu_custom_call.1
= control target key start
LH: loop header
LB: loop body
LE: loop exit
PB: predicated region body
PF: predicated region fallthrough
CT: control target
= control target key end

     0   :  { %9 = vsyncpa [#allocation3], 0  ;;  %s3354_s0 = inlined_call_operand.vmem [shape: f32[640,1], index: 0, kind: input, shape index: {}]   ;;  %s3355_s1 = inlined_call_operand.vmem [shape: f32[48,32], index: 1, kind: input, shape index: {}]   ;;  %s3356_s2 = inlined_call_operand.vmem [shape: f32[320,64], index: 2, kind: input, shape index: {}]   ;;  %s3357_s3 = inlined_call_operand.vmem [shape: f32[72,128], index: 3, kind: input, shape index: {}]   ;;  %s3358_s4 = inlined_call_operand.hbm [shape: f32[16,128], index: 4, kind: output, shape index: {}]  }
   0x1   :  { %11 = vsyncpa [#allocation3 + $0x1], 0  ;;  %s2417_s15 = smov 0   ;;  %s2419_s16 = smov 0  }
   0x2   :  { %s2421_s17 = smov 0   ;;  %s2423_s18 = smov 0  }
   0x3 LB: > { %s2438_s19 = sadd.s32 4294967295, %s2381_s18   ;;  %s1925_s20 = sadd.s32 4294967294, %s2381_s18   ;;  %s2381_s18 = sphi %s2423_s18, %s3364_s18   ;;  %s2377_s17 = sphi %s2421_s17, %s3363_s17   ;;  %s2373_s16 = sphi %s2419_s16, %s3362_s16   ;;  %s2369_s15 = sphi %s2417_s15, %s3361_s15  }
   0x4   : > { %s2442_s21 = sadd.s32 1, %s2381_s18   ;;  %s113_s22 = sadd.s32 1, %s2377_s17 }
   0x5   : > { %s110_s23 = ssub.s32 %s2381_s18, %s2442_s21  ;;  %p123_p0 = scmp.ne.s32.totalorder %s2377_s17, %s2373_s16 }
   0x6   : > { %p111_p1 = scmp.eq.s32.totalorder %s110_s23, 0  ;;  %p124_p2 = scmp.eq.s32.totalorder %s2438_s19, 1 }
   0x7   : > { %p129_p3 = scmp.ne.s32.totalorder %s2373_s16, %s2369_s15  ;;  %p130_p4 = scmp.eq.s32.totalorder %s1925_s20, 1 }
   0x8   : > { %s2453_s24 = scalar_select %p111_p1, %s2377_s17, %s113_s22  }
   0x9   : > { %p2455_p5 = por %p124_p2, %p123_p0  ;;  %p2459_p6 = por %p130_p4, %p129_p3 }
   0xa   : > { %p1928_p7 = scmp.ge.s32.totalorder %s2381_s18, 1  ;;  %p166_p8 = scmp.lt.s32.totalorder %s2381_s18, 3 }
   0xc   : > { %p167_p9 = pnand %p1928_p7, %p166_p8 }
   0xd   : > { %s192_s27 = smul.u32 (!%p167_p9), 40, %s2438_s19  ;;  %v2383_v0 = vmov (!%p167_p9), 0   ;;  %v447_v41 = vlaneseq (!%p167_p9)  ;;  %v198_v45 = vld [vmem:[%s3357_s3] sm:$0xff] (!%p167_p9)  ;;  %v1144_v56 = vld [vmem:[%s3355_s1 + $0x8] sm:$0xff] (!%p167_p9)  ;;  %s2384_s29 = smov (!%p167_p9), 16   ;;  %vm1061_vm0 = vcmask (!%p167_p9), 130048  }
   0xe   : > { %170 = sbr.rel (%p167_p9) target bundleno = 1222 (0x4c6), region = 36  ;;  %2302 = vset.pattern.permute.xlu1 (!%p167_p9), %v2383_v0  ;;  %2301 = vset.pattern.permute.xlu0 (!%p167_p9), %v2383_v0  ;;  %v1143_v55 = vld [vmem:[%s3355_s1] sm:$0xff] (!%p167_p9)  ;;  %s2385_s30 = smov (!%p167_p9), 32   ;;  %vm1102_vm1 = vcmask (!%p167_p9), 261120   ;;  %vm1153_vm2 = vcmask (!%p167_p9), 392192   ;;  %vm1578_vm3 = vcmask (!%p167_p9), 523264  }
   0xf   : > { %p193_p10 = scmp.lt.s32.totalorder (!%p167_p9), %s192_s27, 79  ;;  %v2511_v42 = vshrl.u32 (!%p167_p9), %v447_v41, 7  ;;  %v2186_v58 = vpack.c.bf16 (!%p167_p9), %v1144_v56, %v1143_v55  ;;  %s2387_s20 = smov (!%p167_p9), 64   ;;  %vm1580_vm4 = vcmask (!%p167_p9), 785408   ;;  %vm2390_vm5 = vmmov (!%p167_p9), 0  }
  0x10   : > { %s2389_s8 = smov (!%p167_p9), 96   ;;  %s189_s7 = sand.u32 (!%p167_p9), 1, %s2373_s16  }
  0x11   : > { %v449_v43 = vsub.s32 (!%p167_p9), 0, %v2511_v42  ;;  %v493_v44 = vsub.s32 (!%p167_p9), 1, %v2511_v42  ;;  %v577_v48 = vsub.s32 (!%p167_p9), 2, %v2511_v42  ;;  %v661_v51 = vsub.s32 (!%p167_p9), 3, %v2511_v42  ;;  %2187 = vmatprep.subr.bf16.mxu0 (!%p167_p9), %v2186_v58  ;;  %s1974_s9 = sshll.u32 (!%p167_p9), %s2438_s19, 7  ;;  %s1853_s14 = scalar_lea.sflag (!%p167_p9), [#allocation3], %s189_s7 }
  0x12   : > { %2189 = vmatpush3.bf16.msra.mxu0 (!%p167_p9), %v2186_v58  ;;  %s3312_s13 = scalar_lea.hbm (!%p167_p9), %s3358_s4, %s1974_s9  ;;  %s2391_s19 = smov (!%p167_p9), [#allocation2]  }
  0x13   : > { %v2518_v46 = vrot.slane (!%p167_p9), %v198_v45, %v449_v43  ;;  %v2520_v47 = vrot.slane (!%p167_p9), %v198_v45, %v493_v44  ;;  %v2524_v52 = vrot.slane (!%p167_p9), %v198_v45, %v577_v48  ;;  %v2538_v0 = vrot.slane (!%p167_p9), %v198_v45, %v661_v51  ;;  %s2323_s22 = sshll.u32 (!%p167_p9), %s2391_s19, 4  ;;  %s2324_s22 = int_to_ptr.vmem [resolvable:$false] %s2323_s22 }
  0x14   : > { %s2325_s23 = scalar_lea.vmem (!%p167_p9), %s2324_s22, 256 }
  0x15   : > { %s3366_s27 = smov (!%p193_p10, %s192_s27), 79  ;;  %v451_v53 = vmul.f32 0.0, %v2518_v46 }
  0x16   : > { %s1930_s28 = sshll.u32 %s3366_s27, 3 }
  0x17   : > { %s2469_s5 = scalar_lea.vmem %s3354_s0, %s1930_s28 }
  0x18   : > { %v209_v1 = vld [vmem:[%s2469_s5 + $0x10] sm:$0xff]  ;;  %v207_v2 = vld [vmem:[%s2469_s5] sm:$0xff]  ;;  %v210_v3 = vld [vmem:[%s2469_s5 + $0x18] sm:$0xff] }
  0x19   : > { %259 = vperm.xlu1 %2302, %v209_v1   ;;  %249 = vperm.xlu0 %2301, %v207_v2   ;;  %v208_v4 = vld [vmem:[%s2469_s5 + $0x8] sm:$0xff]  ;;  %v211_v6 = vld [vmem:[%s2469_s5 + $0x20] sm:$0xff]  ;;  %v214_v7 = vld [vmem:[%s2469_s5 + $0x38] sm:$0xff] }
  0x1a   : > { %v212_v5 = vld [vmem:[%s2469_s5 + $0x28] sm:$0xff]  ;;  %v213_v8 = vld [vmem:[%s2469_s5 + $0x30] sm:$0xff]  ;;  %v215_v10 = vld [vmem:[%s2469_s5 + $0x40] sm:$0xff] }
  0x1b   : > { %v216_v9 = vld [vmem:[%s2469_s5 + $0x48] sm:$0xff]  ;;  %v218_v11 = vld [vmem:[%s2469_s5 + $0x58] sm:$0xff]  ;;  %v217_v12 = vld [vmem:[%s2469_s5 + $0x50] sm:$0xff] }
  0x1c   : > { %v220_v13 = vld [vmem:[%s2469_s5 + $0x68] sm:$0xff]  ;;  %v219_v14 = vld [vmem:[%s2469_s5 + $0x60] sm:$0xff]  ;;  %v222_v15 = vld [vmem:[%s2469_s5 + $0x78] sm:$0xff] }
  0x1d   : > { %264 = vperm.xlu1 %2302, %v210_v3   ;;  %254 = vperm.xlu0 %2301, %v208_v4   ;;  %v221_v16 = vld [vmem:[%s2469_s5 + $0x70] sm:$0xff]  ;;  %v224_v17 = vld [vmem:[%s2469_s5 + $0x88] sm:$0xff]  ;;  %v223_v18 = vld [vmem:[%s2469_s5 + $0x80] sm:$0xff] }
  0x1e   : > { %v226_v19 = vld [vmem:[%s2469_s5 + $0x98] sm:$0xff]  ;;  %v225_v20 = vld [vmem:[%s2469_s5 + $0x90] sm:$0xff]  ;;  %v228_v21 = vld [vmem:[%s2469_s5 + $0xa8] sm:$0xff] }
  0x1f   : > { %v227_v22 = vld [vmem:[%s2469_s5 + $0xa0] sm:$0xff]  ;;  %v230_v23 = vld [vmem:[%s2469_s5 + $0xb8] sm:$0xff]  ;;  %v229_v24 = vld [vmem:[%s2469_s5 + $0xb0] sm:$0xff] }
  0x20   : > { %v232_v25 = vld [vmem:[%s2469_s5 + $0xc8] sm:$0xff]  ;;  %v231_v26 = vld [vmem:[%s2469_s5 + $0xc0] sm:$0xff]  ;;  %v234_v27 = vld [vmem:[%s2469_s5 + $0xd8] sm:$0xff] }
  0x21   : > { %274 = vperm.xlu1 %2302, %v212_v5   ;;  %269 = vperm.xlu0 %2301, %v211_v6   ;;  %v233_v28 = vld [vmem:[%s2469_s5 + $0xd0] sm:$0xff]  ;;  %v236_v29 = vld [vmem:[%s2469_s5 + $0xe8] sm:$0xff]  ;;  %v235_v30 = vld [vmem:[%s2469_s5 + $0xe0] sm:$0xff] }
  0x22   : > { %v238_v31 = vld [vmem:[%s2469_s5 + $0xf8] sm:$0xff]  ;;  %v237_v32 = vld [vmem:[%s2469_s5 + $0xf0] sm:$0xff]  ;;  %v240_v33 = vld [vmem:[%s2469_s5 + $0x108] sm:$0xff] }
  0x23   : > { %v239_v34 = vld [vmem:[%s2469_s5 + $0x100] sm:$0xff]  ;;  %v242_v35 = vld [vmem:[%s2469_s5 + $0x118] sm:$0xff]  ;;  %v241_v36 = vld [vmem:[%s2469_s5 + $0x110] sm:$0xff] }
  0x24   : > { %v244_v37 = vld [vmem:[%s2469_s5 + $0x128] sm:$0xff]  ;;  %v243_v38 = vld [vmem:[%s2469_s5 + $0x120] sm:$0xff]  ;;  %v246_v39 = vld [vmem:[%s2469_s5 + $0x138] sm:$0xff] }
  0x25   : > { %284 = vperm.xlu1 %2302, %v214_v7   ;;  %279 = vperm.xlu0 %2301, %v213_v8   ;;  %v245_v40 = vld [vmem:[%s2469_s5 + $0x130] sm:$0xff]  ;;  %v1146_v6 = vld [vmem:[%s3355_s1 + $0x18] sm:$0xff] }
  0x26   : > { %v1145_v5 = vld [vmem:[%s3355_s1 + $0x10] sm:$0xff] }
  0x27   : > { %v2190_v8 = vpack.c.bf16 %v1146_v6, %v1145_v5 }
  0x29   : > { %294 = vperm.xlu1 %2302, %v216_v9   ;;  %289 = vperm.xlu0 %2301, %v215_v10  }
  0x2a   : > { %2191 = vmatprep.subr.bf16.mxu0 %v2190_v8 }
  0x2b   : > { %2193 = vmatpush3.bf16.msra.mxu0 %v2190_v8 }
  0x2d   : > { %304 = vperm.xlu1 %2302, %v218_v11   ;;  %299 = vperm.xlu0 %2301, %v217_v12  }
  0x31   : > { %314 = vperm.xlu1 %2302, %v220_v13   ;;  %309 = vperm.xlu0 %2301, %v219_v14  }
  0x35   : > { %324 = vperm.xlu1 %2302, %v222_v15   ;;  %319 = vperm.xlu0 %2301, %v221_v16  }
  0x39   : > { %334 = vperm.xlu1 %2302, %v224_v17   ;;  %329 = vperm.xlu0 %2301, %v223_v18  }
  0x3d   : > { %344 = vperm.xlu1 %2302, %v226_v19   ;;  %339 = vperm.xlu0 %2301, %v225_v20  }
  0x41   : > { %354 = vperm.xlu1 %2302, %v228_v21   ;;  %349 = vperm.xlu0 %2301, %v227_v22  }
  0x45   : > { %364 = vperm.xlu1 %2302, %v230_v23   ;;  %359 = vperm.xlu0 %2301, %v229_v24   ;;  %v1147_v23 = vld [vmem:[%s3355_s1 + $0x20] sm:$0xff]  ;;  %v1148_v24 = vld [vmem:[%s3355_s1 + $0x28] sm:$0xff] }
  0x49   : > { %374 = vperm.xlu1 %2302, %v232_v25   ;;  %369 = vperm.xlu0 %2301, %v231_v26   ;;  %v2194_v26 = vpack.c.bf16 %v1148_v24, %v1147_v23 }
  0x4b   : > { %2195 = vmatprep.subr.bf16.mxu0 %v2194_v26 }
  0x4c   : > { %2197 = vmatpush3.bf16.msra.mxu0 %v2194_v26 }
  0x4d   : > { %384 = vperm.xlu1 %2302, %v234_v27   ;;  %379 = vperm.xlu0 %2301, %v233_v28  }
  0x51   : > { %394 = vperm.xlu1 %2302, %v236_v29   ;;  %389 = vperm.xlu0 %2301, %v235_v30  }
  0x55   : > { %404 = vperm.xlu1 %2302, %v238_v31   ;;  %399 = vperm.xlu0 %2301, %v237_v32  }
  0x59   : > { %414 = vperm.xlu1 %2302, %v240_v33   ;;  %409 = vperm.xlu0 %2301, %v239_v34  }
  0x5d   : > { %424 = vperm.xlu1 %2302, %v242_v35   ;;  %419 = vperm.xlu0 %2301, %v241_v36  }
  0x61   : > { %434 = vperm.xlu1 %2302, %v244_v37   ;;  %429 = vperm.xlu0 %2301, %v243_v38  }
  0x65   : > { %444 = vperm.xlu1 %2302, %v246_v39   ;;  %439 = vperm.xlu0 %2301, %v245_v40  }
  0x98   : > { %v260_v49 = vpop.permute.xlu1 %259  ;;  %v250_v50 = vpop.permute.xlu0 %249 }
  0x99   : > { %v495_v54 = vmul.f32 %v2520_v47, %v250_v50  ;;  %v497_v57 = vmul.f32 %v2520_v47, %v260_v49  ;;  %v454_v61 = vmul.f32 %v2518_v46, %v260_v49  ;;  %v452_v1 = vmul.f32 %v2518_v46, %v250_v50 }
  0x9a   : > { %v580_v9 = vmul.f32 %v2524_v52, %v260_v49 }
  0x9b   : > { %v535_v2 = vadd.f32 %v495_v54, %v451_v53 }
  0x9c   : > { %v265_v59 = vpop.permute.xlu1 %264  ;;  %v255_v60 = vpop.permute.xlu0 %254 }
  0x9d   : > { %v498_v62 = vmul.f32 %v2520_v47, %v265_v59  ;;  %v453_v63 = vmul.f32 %v2518_v46, %v255_v60  ;;  %v496_v3 = vmul.f32 %v2520_v47, %v255_v60  ;;  %v579_v4 = vmul.f32 %v2524_v52, %v255_v60 }
  0x9e   : > { %v455_v10 = vmul.f32 %v2518_v46, %v265_v59  ;;  %v581_v16 = vmul.f32 %v2524_v52, %v265_v59 }
  0x9f   : > { %v537_v7 = vadd.f32 %v497_v57, %v453_v63  ;;  %v536_v11 = vadd.f32 %v496_v3, %v452_v1  ;;  %v619_v12 = vadd.f32 %v579_v4, %v535_v2  ;;  %v538_v15 = vadd.f32 %v498_v62, %v454_v61 }
  0xa0   : > { %v275_v13 = vpop.permute.xlu1 %274  ;;  %v270_v14 = vpop.permute.xlu0 %269 }
  0xa1   : > { %v500_v17 = vmul.f32 %v2520_v47, %v275_v13  ;;  %v456_v18 = vmul.f32 %v2518_v46, %v270_v14  ;;  %v499_v19 = vmul.f32 %v2520_v47, %v270_v14  ;;  %v582_v20 = vmul.f32 %v2524_v52, %v270_v14 }
  0xa2   : > { %v620_v21 = vadd.f32 %v580_v9, %v536_v11  ;;  %v663_v22 = vadd.f32 %v2538_v0, %v619_v12  ;;  %v621_v25 = vadd.f32 %v581_v16, %v537_v7  ;;  %v457_v31 = vmul.f32 %v2518_v46, %v275_v13 }
  0xa3   : > { %v539_v27 = vadd.f32 %v499_v19, %v455_v10  ;;  %v622_v28 = vadd.f32 %v582_v20, %v538_v15  ;;  %v583_v32 = vmul.f32 %v2524_v52, %v275_v13  ;;  %v540_v33 = vadd.f32 %v500_v17, %v456_v18 }
  0xa4   : > { %v280_v29 = vpop.permute.xlu0 %279  ;;  %v664_v30 = vadd.f32 %v2538_v0, %v620_v21  ;;  %v703_v34 = vmax.f32 %v663_v22, 0.0  ;;  %v285_v35 = vpop.permute.xlu1 %284  ;;  %v665_v39 = vadd.f32 %v2538_v0, %v621_v25 }
  0xa5   : > { %v501_v36 = vmul.f32 %v2520_v47, %v280_v29  ;;  %v584_v37 = vmul.f32 %v2524_v52, %v280_v29  ;;  %v666_v40 = vadd.f32 %v2538_v0, %v622_v28  ;;  %v623_v41 = vadd.f32 %v583_v32, %v539_v27 }
  0xa6   : > { %v704_v38 = vmax.f32 %v664_v30, 0.0  ;;  %v705_v49 = vmax.f32 %v665_v39, 0.0  ;;  %v502_v50 = vmul.f32 %v2520_v47, %v285_v35  ;;  %v585_v51 = vmul.f32 %v2524_v52, %v285_v35 }
  0xa7   : > { %v541_v43 = vadd.f32 %v501_v36, %v457_v31  ;;  %v624_v44 = vadd.f32 %v584_v37, %v540_v33  ;;  %v458_v53 = vmul.f32 %v2518_v46, %v280_v29  ;;  %v706_v55 = vmax.f32 %v666_v40, 0.0 }
  0xa8   : > { %v290_v45 = vpop.permute.xlu0 %289  ;;  %v2570_v48 = vadd.f32 %v704_v38, %v703_v34  ;;  %v2577_v54 = vadd.f32 %v705_v49, %v704_v38  ;;  %v667_v57 = vadd.f32 %v2538_v0, %v623_v41  ;;  %v459_v62 = vmul.f32 %v2518_v46, %v285_v35  ;;  %v295_v2 = vpop.permute.xlu1 %294 }
  0xa9   : > { %v503_v56 = vmul.f32 %v2520_v47, %v290_v45  ;;  %v586_v58 = vmul.f32 %v2524_v52, %v290_v45  ;;  %v2584_v59 = vadd.f32 %v706_v55, %v705_v49  ;;  %v668_v60 = vadd.f32 %v2538_v0, %v624_v44 }
  0xaa   : > { %823 = vrot.lane.b32.xlu0 %v2570_v48, %s2384_s29  ;;  %825 = vrot.lane.b32.xlu1 %v2577_v54, %s2384_s29  ;;  %v625_v61 = vadd.f32 %v585_v51, %v541_v43  ;;  %v542_v63 = vadd.f32 %v502_v50, %v458_v53  ;;  %v707_v1 = vmax.f32 %v667_v57, 0.0  ;;  %v504_v9 = vmul.f32 %v2520_v47, %v295_v2 }
  0xab   : > { %v543_v3 = vadd.f32 %v503_v56, %v459_v62  ;;  %v708_v7 = vmax.f32 %v668_v60, 0.0  ;;  %v587_v10 = vmul.f32 %v2524_v52, %v295_v2  ;;  %v460_v11 = vmul.f32 %v2518_v46, %v290_v45 }
  0xac   : > { %v626_v4 = vadd.f32 %v586_v58, %v542_v63  ;;  %v300_v5 = vpop.permute.xlu0 %299  ;;  %v2590_v6 = vadd.f32 %v707_v1, %v706_v55  ;;  %v669_v8 = vadd.f32 %v2538_v0, %v625_v61  ;;  %v461_v18 = vmul.f32 %v2518_v46, %v295_v2  ;;  %v305_v20 = vpop.permute.xlu1 %304 }
  0xad   : > { %v505_v12 = vmul.f32 %v2520_v47, %v300_v5  ;;  %v588_v13 = vmul.f32 %v2524_v52, %v300_v5  ;;  %v2602_v14 = vadd.f32 %v708_v7, %v707_v1  ;;  %v627_v17 = vadd.f32 %v587_v10, %v543_v3 }
  0xae   : > { %944 = vrot.lane.b32.xlu0 %v2584_v59, %s2385_s30  ;;  %946 = vrot.lane.b32.xlu1 %v2590_v6, %s2385_s30  ;;  %v709_v15 = vmax.f32 %v669_v8, 0.0  ;;  %v670_v16 = vadd.f32 %v2538_v0, %v626_v4  ;;  %v544_v19 = vadd.f32 %v504_v9, %v460_v11  ;;  %v506_v27 = vmul.f32 %v2520_v47, %v305_v20 }
  0xaf   : > { %v545_v21 = vadd.f32 %v505_v12, %v461_v18  ;;  %v671_v26 = vadd.f32 %v2538_v0, %v627_v17  ;;  %v589_v28 = vmul.f32 %v2524_v52, %v305_v20  ;;  %v462_v29 = vmul.f32 %v2518_v46, %v300_v5 }
  0xb0   : > { %v628_v22 = vadd.f32 %v588_v13, %v544_v19  ;;  %v310_v23 = vpop.permute.xlu0 %309  ;;  %v2610_v24 = vadd.f32 %v709_v15, %v708_v7  ;;  %v710_v25 = vmax.f32 %v670_v16, 0.0  ;;  %v463_v36 = vmul.f32 %v2518_v46, %v305_v20  ;;  %v315_v38 = vpop.permute.xlu1 %314 }
  0xb1   : > { %v507_v30 = vmul.f32 %v2520_v47, %v310_v23  ;;  %v590_v31 = vmul.f32 %v2524_v52, %v310_v23  ;;  %v711_v33 = vmax.f32 %v671_v26, 0.0  ;;  %v629_v35 = vadd.f32 %v589_v28, %v545_v21 }
  0xb2   : > { %827 = vrot.lane.b32.xlu0 %v2584_v59, %s2384_s29  ;;  %829 = vrot.lane.b32.xlu1 %v2590_v6, %s2384_s29  ;;  %v2622_v32 = vadd.f32 %v710_v25, %v709_v15  ;;  %v672_v34 = vadd.f32 %v2538_v0, %v628_v22  ;;  %v546_v37 = vadd.f32 %v506_v27, %v462_v29 }
  0xb3   : > { %v547_v39 = vadd.f32 %v507_v30, %v463_v36  ;;  %v2630_v43 = vadd.f32 %v711_v33, %v710_v25  ;;  %v673_v45 = vadd.f32 %v2538_v0, %v629_v35  ;;  %v508_v49 = vmul.f32 %v2520_v47, %v315_v38 }
  0xb4   : > { %v630_v40 = vadd.f32 %v590_v31, %v546_v37  ;;  %v320_v41 = vpop.permute.xlu0 %319  ;;  %v712_v44 = vmax.f32 %v672_v34, 0.0  ;;  %v591_v50 = vmul.f32 %v2524_v52, %v315_v38  ;;  %v464_v51 = vmul.f32 %v2518_v46, %v310_v23  ;;  %v325_v63 = vpop.permute.xlu1 %324 }
  0xb5   : > { %v509_v53 = vmul.f32 %v2520_v47, %v320_v41  ;;  %v592_v55 = vmul.f32 %v2524_v52, %v320_v41  ;;  %v713_v57 = vmax.f32 %v673_v45, 0.0  ;;  %v465_v61 = vmul.f32 %v2518_v46, %v315_v38 }
  0xb6   : > { %948 = vrot.lane.b32.xlu0 %v2602_v14, %s2385_s30  ;;  %950 = vrot.lane.b32.xlu1 %v2610_v24, %s2385_s30  ;;  %v2642_v56 = vadd.f32 %v712_v44, %v711_v33  ;;  %v674_v58 = vadd.f32 %v2538_v0, %v630_v40  ;;  %v631_v60 = vadd.f32 %v591_v50, %v547_v39 }
  0xb7   : > { %v548_v62 = vadd.f32 %v508_v49, %v464_v51  ;;  %v549_v1 = vadd.f32 %v509_v53, %v465_v61  ;;  %v2650_v4 = vadd.f32 %v713_v57, %v712_v44  ;;  %v593_v8 = vmul.f32 %v2524_v52, %v325_v63 }
  0xb8   : > { %v330_v3 = vpop.permute.xlu0 %329  ;;  %v714_v5 = vmax.f32 %v674_v58, 0.0  ;;  %v675_v7 = vadd.f32 %v2538_v0, %v631_v60  ;;  %v510_v9 = vmul.f32 %v2520_v47, %v325_v63  ;;  %v466_v10 = vmul.f32 %v2518_v46, %v320_v41  ;;  %v335_v20 = vpop.permute.xlu1 %334 }
  0xb9   : > { %v632_v2 = vadd.f32 %v592_v55, %v548_v62  ;;  %v511_v11 = vmul.f32 %v2520_v47, %v330_v3  ;;  %v633_v16 = vadd.f32 %v593_v8, %v549_v1  ;;  %v594_v17 = vmul.f32 %v2524_v52, %v330_v3 }
  0xba   : > { %831 = vrot.lane.b32.xlu0 %v2602_v14, %s2384_s29  ;;  %833 = vrot.lane.b32.xlu1 %v2610_v24, %s2384_s29  ;;  %v2661_v12 = vadd.f32 %v714_v5, %v713_v57  ;;  %v715_v13 = vmax.f32 %v675_v7, 0.0  ;;  %v467_v18 = vmul.f32 %v2518_v46, %v325_v63  ;;  %v550_v19 = vadd.f32 %v510_v9, %v466_v10 }
  0xbb   : > { %v676_v15 = vadd.f32 %v2538_v0, %v632_v2  ;;  %v677_v25 = vadd.f32 %v2538_v0, %v633_v16  ;;  %v595_v28 = vmul.f32 %v2524_v52, %v335_v20  ;;  %v512_v29 = vmul.f32 %v2520_v47, %v335_v20 }
  0xbc   : > { %v551_v21 = vadd.f32 %v511_v11, %v467_v18  ;;  %v2670_v22 = vadd.f32 %v715_v13, %v714_v5  ;;  %v634_v26 = vadd.f32 %v594_v17, %v550_v19  ;;  %v340_v27 = vpop.permute.xlu0 %339  ;;  %v468_v30 = vmul.f32 %v2518_v46, %v330_v3  ;;  %v345_v40 = vpop.permute.xlu1 %344 }
  0xbd   : > { %v716_v23 = vmax.f32 %v676_v15, 0.0  ;;  %v513_v31 = vmul.f32 %v2520_v47, %v340_v27  ;;  %v717_v34 = vmax.f32 %v677_v25, 0.0  ;;  %v596_v36 = vmul.f32 %v2524_v52, %v340_v27 }
  0xbe   : > { %952 = vrot.lane.b32.xlu0 %v2622_v32, %s2385_s30  ;;  %954 = vrot.lane.b32.xlu1 %v2630_v43, %s2385_s30  ;;  %v635_v35 = vadd.f32 %v595_v28, %v551_v21  ;;  %v678_v37 = vadd.f32 %v2538_v0, %v634_v26  ;;  %v469_v38 = vmul.f32 %v2518_v46, %v335_v20 }
  0xbf   : > { %v2681_v33 = vadd.f32 %v716_v23, %v715_v13  ;;  %v552_v39 = vadd.f32 %v512_v29, %v468_v30  ;;  %v2690_v44 = vadd.f32 %v717_v34, %v716_v23  ;;  %v597_v53 = vmul.f32 %v2524_v52, %v345_v40 }
  0xc0   : > { %v553_v41 = vadd.f32 %v513_v31, %v469_v38  ;;  %v679_v45 = vadd.f32 %v2538_v0, %v635_v35  ;;  %v350_v50 = vpop.permute.xlu0 %349  ;;  %v718_v51 = vmax.f32 %v678_v37, 0.0  ;;  %v514_v55 = vmul.f32 %v2520_v47, %v345_v40  ;;  %v355_v5 = vpop.permute.xlu1 %354 }
  0xc1   : > { %v636_v49 = vadd.f32 %v596_v36, %v552_v39  ;;  %v470_v57 = vmul.f32 %v2518_v46, %v340_v27  ;;  %v515_v58 = vmul.f32 %v2520_v47, %v350_v50  ;;  %v598_v62 = vmul.f32 %v2524_v52, %v350_v50 }
  0xc2   : > { %835 = vrot.lane.b32.xlu0 %v2622_v32, %s2384_s29  ;;  %837 = vrot.lane.b32.xlu1 %v2630_v43, %s2384_s29  ;;  %v719_v60 = vmax.f32 %v679_v45, 0.0  ;;  %v637_v61 = vadd.f32 %v597_v53, %v553_v41  ;;  %v2702_v63 = vadd.f32 %v718_v51, %v717_v34  ;;  %v471_v2 = vmul.f32 %v2518_v46, %v345_v40 }
  0xc3   : > { %v680_v1 = vadd.f32 %v2538_v0, %v636_v49  ;;  %v554_v3 = vadd.f32 %v514_v55, %v470_v57  ;;  %v599_v15 = vmul.f32 %v2524_v52, %v355_v5  ;;  %v516_v16 = vmul.f32 %v2520_v47, %v355_v5 }
  0xc4   : > { %v555_v7 = vadd.f32 %v515_v58, %v471_v2  ;;  %v2710_v8 = vadd.f32 %v719_v60, %v718_v51  ;;  %v681_v9 = vadd.f32 %v2538_v0, %v637_v61  ;;  %v360_v11 = vpop.permute.xlu0 %359  ;;  %v472_v17 = vmul.f32 %v2518_v46, %v350_v50  ;;  %v365_v28 = vpop.permute.xlu1 %364 }
  0xc5   : > { %v638_v10 = vadd.f32 %v598_v62, %v554_v3  ;;  %v720_v13 = vmax.f32 %v680_v1, 0.0  ;;  %v517_v18 = vmul.f32 %v2520_v47, %v360_v11  ;;  %v600_v21 = vmul.f32 %v2524_v52, %v360_v11 }
  0xc6   : > { %956 = vrot.lane.b32.xlu0 %v2642_v56, %s2385_s30  ;;  %958 = vrot.lane.b32.xlu1 %v2650_v4, %s2385_s30  ;;  %v721_v19 = vmax.f32 %v681_v9, 0.0  ;;  %v639_v20 = vadd.f32 %v599_v15, %v555_v7  ;;  %v473_v26 = vmul.f32 %v2518_v46, %v355_v5  ;;  %v556_v27 = vadd.f32 %v516_v16, %v472_v17 }
  0xc7   : > { %v2722_v23 = vadd.f32 %v720_v13, %v719_v60  ;;  %v682_v25 = vadd.f32 %v2538_v0, %v638_v10  ;;  %v601_v37 = vmul.f32 %v2524_v52, %v365_v28  ;;  %v518_v38 = vmul.f32 %v2520_v47, %v365_v28 }
  0xc8   : > { %v557_v29 = vadd.f32 %v517_v18, %v473_v26  ;;  %v2730_v30 = vadd.f32 %v721_v19, %v720_v13  ;;  %v683_v31 = vadd.f32 %v2538_v0, %v639_v20  ;;  %v640_v34 = vadd.f32 %v600_v21, %v556_v27  ;;  %v370_v35 = vpop.permute.xlu0 %369  ;;  %v375_v57 = vpop.permute.xlu1 %374 }
  0xc9   : > { %v722_v36 = vmax.f32 %v682_v25, 0.0  ;;  %v474_v39 = vmul.f32 %v2518_v46, %v360_v11  ;;  %v519_v40 = vmul.f32 %v2520_v47, %v370_v35  ;;  %v602_v49 = vmul.f32 %v2524_v52, %v370_v35 }
  0xca   : > { %839 = vrot.lane.b32.xlu0 %v2642_v56, %s2384_s29  ;;  %841 = vrot.lane.b32.xlu1 %v2650_v4, %s2384_s29  ;;  %v723_v41 = vmax.f32 %v683_v31, 0.0  ;;  %v641_v45 = vadd.f32 %v601_v37, %v557_v29  ;;  %v684_v51 = vadd.f32 %v2538_v0, %v640_v34  ;;  %v475_v53 = vmul.f32 %v2518_v46, %v365_v28 }
  0xcb   : > { %v2742_v50 = vadd.f32 %v722_v36, %v721_v19  ;;  %v558_v55 = vadd.f32 %v518_v38, %v474_v39  ;;  %v603_v3 = vmul.f32 %v2524_v52, %v375_v57  ;;  %v520_v5 = vmul.f32 %v2520_v47, %v375_v57 }
  0xcc   : > { %v559_v58 = vadd.f32 %v519_v40, %v475_v53  ;;  %v2750_v60 = vadd.f32 %v723_v41, %v722_v36  ;;  %v685_v61 = vadd.f32 %v2538_v0, %v641_v45  ;;  %v380_v1 = vpop.permute.xlu0 %379  ;;  %v724_v2 = vmax.f32 %v684_v51, 0.0  ;;  %v385_v18 = vpop.permute.xlu1 %384 }
  0xcd   : > { %v642_v62 = vadd.f32 %v602_v49, %v558_v55  ;;  %v476_v7 = vmul.f32 %v2518_v46, %v370_v35  ;;  %v521_v9 = vmul.f32 %v2520_v47, %v380_v1  ;;  %v604_v13 = vmul.f32 %v2524_v52, %v380_v1 }
  0xce   : > { %960 = vrot.lane.b32.xlu0 %v2661_v12, %s2385_s30  ;;  %962 = vrot.lane.b32.xlu1 %v2670_v22, %s2385_s30  ;;  %v725_v10 = vmax.f32 %v685_v61, 0.0  ;;  %v643_v11 = vadd.f32 %v603_v3, %v559_v58  ;;  %v2762_v15 = vadd.f32 %v724_v2, %v723_v41  ;;  %v477_v17 = vmul.f32 %v2518_v46, %v375_v57 }
  0xcf   : > { %v686_v16 = vadd.f32 %v2538_v0, %v642_v62  ;;  %v560_v19 = vadd.f32 %v520_v5, %v476_v7  ;;  %v605_v29 = vmul.f32 %v2524_v52, %v385_v18  ;;  %v522_v31 = vmul.f32 %v2520_v47, %v385_v18 }
  0xd0   : > { %v561_v20 = vadd.f32 %v521_v9, %v477_v17  ;;  %v2770_v21 = vadd.f32 %v725_v10, %v724_v2  ;;  %v687_v25 = vadd.f32 %v2538_v0, %v643_v11  ;;  %v390_v27 = vpop.permute.xlu0 %389  ;;  %v478_v34 = vmul.f32 %v2518_v46, %v380_v1  ;;  %v395_v36 = vpop.permute.xlu1 %394 }
  0xd1   : > { %v644_v26 = vadd.f32 %v604_v13, %v560_v19  ;;  %v726_v28 = vmax.f32 %v686_v16, 0.0  ;;  %v523_v37 = vmul.f32 %v2520_v47, %v390_v27  ;;  %v606_v39 = vmul.f32 %v2524_v52, %v390_v27 }
  0xd2   : > { %843 = vrot.lane.b32.xlu0 %v2661_v12, %s2384_s29  ;;  %845 = vrot.lane.b32.xlu1 %v2670_v22, %s2384_s29  ;;  %v645_v35 = vadd.f32 %v605_v29, %v561_v20  ;;  %v727_v38 = vmax.f32 %v687_v25, 0.0  ;;  %v479_v45 = vmul.f32 %v2518_v46, %v385_v18  ;;  %v562_v49 = vadd.f32 %v522_v31, %v478_v34 }
  0xd3   : > { %v2782_v40 = vadd.f32 %v726_v28, %v725_v10  ;;  %v688_v41 = vadd.f32 %v2538_v0, %v644_v26  ;;  %v607_v62 = vmul.f32 %v2524_v52, %v395_v36  ;;  %v524_v2 = vmul.f32 %v2520_v47, %v395_v36 }
  0xd4   : > { %v563_v51 = vadd.f32 %v523_v37, %v479_v45  ;;  %v400_v53 = vpop.permute.xlu0 %399  ;;  %v2790_v55 = vadd.f32 %v727_v38, %v726_v28  ;;  %v689_v57 = vadd.f32 %v2538_v0, %v645_v35  ;;  %v646_v58 = vadd.f32 %v606_v39, %v562_v49  ;;  %v405_v1 = vpop.permute.xlu1 %404 }
  0xd5   : > { %v728_v61 = vmax.f32 %v688_v41, 0.0  ;;  %v480_v3 = vmul.f32 %v2518_v46, %v390_v27  ;;  %v525_v7 = vmul.f32 %v2520_v47, %v400_v53  ;;  %v608_v10 = vmul.f32 %v2524_v52, %v400_v53 }
  0xd6   : > { %964 = vrot.lane.b32.xlu0 %v2681_v33, %s2385_s30  ;;  %966 = vrot.lane.b32.xlu1 %v2690_v44, %s2385_s30  ;;  %v647_v5 = vadd.f32 %v607_v62, %v563_v51  ;;  %v729_v9 = vmax.f32 %v689_v57, 0.0  ;;  %v690_v13 = vadd.f32 %v2538_v0, %v646_v58  ;;  %v481_v16 = vmul.f32 %v2518_v46, %v395_v36 }
  0xd7   : > { %v2802_v11 = vadd.f32 %v728_v61, %v727_v38  ;;  %v564_v18 = vadd.f32 %v524_v2, %v480_v3  ;;  %v609_v29 = vmul.f32 %v2524_v52, %v405_v1  ;;  %v526_v31 = vmul.f32 %v2520_v47, %v405_v1 }
  0xd8   : > { %v410_v17 = vpop.permute.xlu0 %409  ;;  %v565_v19 = vadd.f32 %v525_v7, %v481_v16  ;;  %v415_v20 = vpop.permute.xlu1 %414  ;;  %v2810_v25 = vadd.f32 %v729_v9, %v728_v61  ;;  %v691_v26 = vadd.f32 %v2538_v0, %v647_v5  ;;  %v730_v28 = vmax.f32 %v690_v13, 0.0 }
  0xd9   : > { %v648_v27 = vadd.f32 %v608_v10, %v564_v18  ;;  %v482_v34 = vmul.f32 %v2518_v46, %v400_v53  ;;  %v527_v36 = vmul.f32 %v2520_v47, %v410_v17  ;;  %v610_v39 = vmul.f32 %v2524_v52, %v410_v17 }
  0xda   : > { %847 = vrot.lane.b32.xlu0 %v2681_v33, %s2384_s29  ;;  %849 = vrot.lane.b32.xlu1 %v2690_v44, %s2384_s29  ;;  %v649_v35 = vadd.f32 %v609_v29, %v565_v19  ;;  %v731_v38 = vmax.f32 %v691_v26, 0.0  ;;  %v2822_v41 = vadd.f32 %v730_v28, %v729_v9  ;;  %v483_v49 = vmul.f32 %v2518_v46, %v405_v1 }
  0xdb   : > { %v692_v45 = vadd.f32 %v2538_v0, %v648_v27  ;;  %v566_v53 = vadd.f32 %v526_v31, %v482_v34  ;;  %v611_v3 = vmul.f32 %v2524_v52, %v415_v20  ;;  %v528_v1 = vmul.f32 %v2520_v47, %v415_v20 }
  0xdc   : > { %v420_v37 = vpop.permute.xlu0 %419  ;;  %v425_v51 = vpop.permute.xlu1 %424  ;;  %v567_v57 = vadd.f32 %v527_v36, %v483_v49  ;;  %v2830_v58 = vadd.f32 %v731_v38, %v730_v28  ;;  %v693_v61 = vadd.f32 %v2538_v0, %v649_v35  ;;  %v484_v7 = vmul.f32 %v2518_v46, %v410_v17 }
  0xdd   : > { %v650_v62 = vadd.f32 %v610_v39, %v566_v53  ;;  %v732_v2 = vmax.f32 %v692_v45, 0.0  ;;  %v529_v10 = vmul.f32 %v2520_v47, %v420_v37  ;;  %v612_v19 = vmul.f32 %v2524_v52, %v420_v37 }
  0xde   : > { %968 = vrot.lane.b32.xlu0 %v2702_v63, %s2385_s30  ;;  %970 = vrot.lane.b32.xlu1 %v2710_v8, %s2385_s30  ;;  %v651_v9 = vadd.f32 %v611_v3, %v567_v57  ;;  %v733_v16 = vmax.f32 %v693_v61, 0.0  ;;  %v485_v27 = vmul.f32 %v2518_v46, %v415_v20  ;;  %v568_v17 = vadd.f32 %v528_v1, %v484_v7 }
  0xdf   : > { %v694_v18 = vadd.f32 %v2538_v0, %v650_v62  ;;  %v2843_v26 = vadd.f32 %v732_v2, %v731_v38  ;;  %v613_v38 = vmul.f32 %v2524_v52, %v425_v51  ;;  %v530_v20 = vmul.f32 %v2520_v47, %v425_v51 }
  0xe0   : > { %v430_v5 = vpop.permute.xlu0 %429  ;;  %v435_v13 = vpop.permute.xlu1 %434  ;;  %v695_v28 = vadd.f32 %v2538_v0, %v651_v9  ;;  %v569_v29 = vadd.f32 %v529_v10, %v485_v27  ;;  %v2851_v34 = vadd.f32 %v733_v16, %v732_v2  ;;  %v652_v36 = vadd.f32 %v612_v19, %v568_v17 }
  0xe1   : > { %v734_v35 = vmax.f32 %v694_v18, 0.0  ;;  %v486_v45 = vmul.f32 %v2518_v46, %v420_v37  ;;  %v531_v53 = vmul.f32 %v2520_v47, %v430_v5  ;;  %v614_v2 = vmul.f32 %v2524_v52, %v430_v5 }
  0xe2   : > { %851 = vrot.lane.b32.xlu0 %v2702_v63, %s2384_s29  ;;  %853 = vrot.lane.b32.xlu1 %v2710_v8, %s2384_s29  ;;  %v653_v49 = vadd.f32 %v613_v38, %v569_v29  ;;  %v735_v61 = vmax.f32 %v695_v28, 0.0  ;;  %v696_v62 = vadd.f32 %v2538_v0, %v652_v36  ;;  %v487_v1 = vmul.f32 %v2518_v46, %v425_v51 }
  0xe3   : > { %v2863_v3 = vadd.f32 %v734_v35, %v733_v16  ;;  %v570_v7 = vadd.f32 %v530_v20, %v486_v45  ;;  %v615_v28 = vmul.f32 %v2524_v52, %v435_v13  ;;  %v532_v29 = vmul.f32 %v2520_v47, %v435_v13 }
  0xe4   : > { %v440_v31 = vpop.permute.xlu0 %439  ;;  %v445_v39 = vpop.permute.xlu1 %444  ;;  %v697_v9 = vadd.f32 %v2538_v0, %v653_v49  ;;  %v571_v10 = vadd.f32 %v531_v53, %v487_v1  ;;  %v2872_v19 = vadd.f32 %v735_v61, %v734_v35  ;;  %v736_v27 = vmax.f32 %v696_v62, 0.0 }
  0xe5   : > { %v654_v51 = vadd.f32 %v614_v2, %v570_v7  ;;  %v488_v36 = vmul.f32 %v2518_v46, %v430_v5  ;;  %v533_v38 = vmul.f32 %v2520_v47, %v440_v31  ;;  %v616_v62 = vmul.f32 %v2524_v52, %v440_v31 }
  0xe6   : > { %972 = vrot.lane.b32.xlu0 %v2722_v23, %s2385_s30  ;;  %974 = vrot.lane.b32.xlu1 %v2730_v30, %s2385_s30  ;;  %v655_v35 = vadd.f32 %v615_v28, %v571_v10  ;;  %v737_v53 = vmax.f32 %v697_v9, 0.0  ;;  %v2888_v1 = vadd.f32 %v736_v27, %v735_v61  ;;  %v489_v5 = vmul.f32 %v2518_v46, %v435_v13 }
  0xe7   : > { %v572_v7 = vadd.f32 %v532_v29, %v488_v36 }
  0xe8   : > { %v699_v9 = vadd.f32 %v2538_v0, %v655_v35  ;;  %v573_v10 = vadd.f32 %v533_v38, %v489_v5 }
  0xe9   : > { %v656_v28 = vadd.f32 %v616_v62, %v572_v7 }
  0xea   : > { %855 = vrot.lane.b32.xlu0 %v2722_v23, %s2384_s29  ;;  %857 = vrot.lane.b32.xlu1 %v2730_v30, %s2384_s29  ;;  %v739_v35 = vmax.f32 %v699_v9, 0.0 }
  0xee   : > { %976 = vrot.lane.b32.xlu0 %v2742_v50, %s2385_s30  ;;  %978 = vrot.lane.b32.xlu1 %v2750_v60, %s2385_s30 }
  0xf2   : > { %859 = vrot.lane.b32.xlu0 %v2742_v50, %s2384_s29  ;;  %861 = vrot.lane.b32.xlu1 %v2750_v60, %s2384_s29 }
  0xf6   : > { %980 = vrot.lane.b32.xlu0 %v2762_v15, %s2385_s30  ;;  %982 = vrot.lane.b32.xlu1 %v2770_v21, %s2385_s30 }
  0xfa   : > { %863 = vrot.lane.b32.xlu0 %v2762_v15, %s2384_s29  ;;  %865 = vrot.lane.b32.xlu1 %v2770_v21, %s2384_s29 }
  0xfe   : > { %984 = vrot.lane.b32.xlu0 %v2782_v40, %s2385_s30  ;;  %986 = vrot.lane.b32.xlu1 %v2790_v55, %s2385_s30 }
 0x102   : > { %867 = vrot.lane.b32.xlu0 %v2782_v40, %s2384_s29  ;;  %869 = vrot.lane.b32.xlu1 %v2790_v55, %s2384_s29 }
 0x106   : > { %988 = vrot.lane.b32.xlu0 %v2802_v11, %s2385_s30  ;;  %990 = vrot.lane.b32.xlu1 %v2810_v25, %s2385_s30 }
 0x10a   : > { %871 = vrot.lane.b32.xlu0 %v2802_v11, %s2384_s29  ;;  %873 = vrot.lane.b32.xlu1 %v2810_v25, %s2384_s29 }
 0x10e   : > { %992 = vrot.lane.b32.xlu0 %v2822_v41, %s2385_s30  ;;  %994 = vrot.lane.b32.xlu1 %v2830_v58, %s2385_s30 }
 0x112   : > { %875 = vrot.lane.b32.xlu0 %v2822_v41, %s2384_s29  ;;  %877 = vrot.lane.b32.xlu1 %v2830_v58, %s2384_s29 }
 0x116   : > { %996 = vrot.lane.b32.xlu0 %v2843_v26, %s2385_s30  ;;  %998 = vrot.lane.b32.xlu1 %v2851_v34, %s2385_s30 }
 0x11a   : > { %879 = vrot.lane.b32.xlu0 %v2843_v26, %s2384_s29  ;;  %881 = vrot.lane.b32.xlu1 %v2851_v34, %s2384_s29 }
 0x11c   : > { %v824_v57 = vpop.permute.xlu0 %823  ;;  %v826_v37 = vpop.permute.xlu1 %825 }
 0x11d   : > { %v1062_v18 = vsel %vm1061_vm0, 0.0, %v824_v57  ;;  %v1063_v20 = vsel %vm1061_vm0, 0.0, %v826_v37  ;;  %v698_v57 = vadd.f32 %v2538_v0, %v654_v51  ;;  %v534_v37 = vmul.f32 %v2520_v47, %v445_v39 }
 0x11e   : > { %1000 = vrot.lane.b32.xlu0 %v2863_v3, %s2385_s30  ;;  %1002 = vrot.lane.b32.xlu1 %v2872_v19, %s2385_s30  ;;  %v617_v47 = vmul.f32 %v2524_v52, %v445_v39  ;;  %v700_v39 = vadd.f32 %v2538_v0, %v656_v28 }
 0x11f   : > { %v738_v51 = vmax.f32 %v698_v57, 0.0 }
 0x120   : > { %v945_v16 = vpop.permute.xlu0 %944  ;;  %v947_v45 = vpop.permute.xlu1 %946 }
 0x121   : > { %v1103_v17 = vsel %vm1102_vm1, %v1062_v18, %v945_v16  ;;  %v1104_v2 = vsel %vm1102_vm1, %v1063_v20, %v947_v45  ;;  %v2900_v16 = vadd.f32 %v737_v53, %v736_v27  ;;  %v657_v27 = vadd.f32 %v617_v47, %v573_v10 }
 0x122   : > { %2088 = vmatprep.mubr.msk.f32.mxu0 %vm1153_vm2, %v1103_v17  ;;  %883 = vrot.lane.b32.xlu0 %v2863_v3, %s2384_s29  ;;  %v490_v17 = vmul.f32 %v2518_v46, %v440_v31  ;;  %v2915_v45 = vadd.f32 %v738_v51, %v737_v53  ;;  %v2925_v57 = vadd.f32 %v739_v35, %v738_v51  ;;  %v740_v53 = vmax.f32 %v700_v39, 0.0 }
 0x123   : > { %885 = vrot.lane.b32.xlu1 %v2872_v19, %s2384_s29  ;;  %2089 = vmatmul.mubr.msk.f32.vlgmr.msra.gmra.mrb[0].mxu0 %vm1153_vm2, %v1104_v2 }
 0x124   : > { %v828_v49 = vpop.permute.xlu0 %827  ;;  %v830_v18 = vpop.permute.xlu1 %829  ;;  %v574_v38 = vadd.f32 %v534_v37, %v490_v17 }
 0x125   : > { %v1064_v61 = vsel %vm1061_vm0, %v2570_v48, %v828_v49  ;;  %v618_v48 = vmul.f32 0.0, %v2524_v52  ;;  %v1065_v36 = vsel %vm1061_vm0, %v2577_v54, %v830_v18  ;;  %v701_v52 = vadd.f32 %v2538_v0, %v657_v27 }
 0x126   : > { %1004 = vrot.lane.b32.xlu0 %v2888_v1, %s2385_s30  ;;  %v2936_v18 = vadd.f32 %v740_v53, %v739_v35 }
 0x127   : > { %1006 = vrot.lane.b32.xlu1 %v2900_v16, %s2385_s30  ;;  %v658_v2 = vadd.f32 %v618_v48, %v574_v38  ;;  %v741_v9 = vmax.f32 %v701_v52, 0.0 }
 0x128   : > { %v949_v13 = vpop.permute.xlu0 %948  ;;  %v951_v46 = vpop.permute.xlu1 %950 }
 0x129   : > { %v1105_v29 = vsel %vm1102_vm1, %v1064_v61, %v949_v13  ;;  %v1106_v20 = vsel %vm1102_vm1, %v1065_v36, %v951_v46  ;;  %v702_v61 = vadd.f32 %v2538_v0, %v658_v2  ;;  %v2946_v51 = vadd.f32 %v741_v9, %v740_v53 }
 0x12a   : > { %2091 = vmatprep.mubr.msk.f32.mxu0 %vm1153_vm2, %v1105_v29  ;;  %887 = vrot.lane.b32.xlu0 %v2888_v1, %s2384_s29 }
 0x12b   : > { %889 = vrot.lane.b32.xlu1 %v2900_v16, %s2384_s29  ;;  %2092 = vmatmul.mubr.msk.f32.gmra.mrb[2].mxu0 %vm1153_vm2, %v1106_v20  ;;  %v742_v29 = vmax.f32 %v702_v61, 0.0 }
 0x12c   : > { %v832_v31 = vpop.permute.xlu0 %831  ;;  %v834_v54 = vpop.permute.xlu1 %833 }
 0x12d   : > { %v1066_v49 = vsel %vm1061_vm0, %v2584_v59, %v832_v31  ;;  %v1067_v7 = vsel %vm1061_vm0, %v2590_v6, %v834_v54  ;;  %v781_v27 = vadd.f32 %v742_v29, %v741_v9 }
 0x12e   : > { %1008 = vrot.lane.b32.xlu0 %v2915_v45, %s2385_s30 }
 0x12f   : > { %1010 = vrot.lane.b32.xlu1 %v2925_v57, %s2385_s30 }
 0x130   : > { %v953_v62 = vpop.permute.xlu0 %952  ;;  %v955_v37 = vpop.permute.xlu1 %954 }
 0x131   : > { %v1107_v5 = vsel %vm1102_vm1, %v1066_v49, %v953_v62  ;;  %v1108_v10 = vsel %vm1102_vm1, %v1067_v7, %v955_v37 }
 0x132   : > { %2094 = vmatprep.mubr.msk.f32.mxu0 %vm1153_vm2, %v1107_v5  ;;  %891 = vrot.lane.b32.xlu0 %v2915_v45, %s2384_s29 }
 0x133   : > { %893 = vrot.lane.b32.xlu1 %v2925_v57, %s2384_s29  ;;  %2095 = vmatmul.mubr.msk.f32.gmra.mrb[4].mxu0 %vm1153_vm2, %v1108_v10 }
 0x134   : > { %v836_v59 = vpop.permute.xlu0 %835  ;;  %v838_v13 = vpop.permute.xlu1 %837 }
 0x135   : > { %v1068_v6 = vsel %vm1061_vm0, %v2602_v14, %v836_v59  ;;  %v1069_v0 = vsel %vm1061_vm0, %v2610_v24, %v838_v13 }
 0x136   : > { %1012 = vrot.lane.b32.xlu0 %v2936_v18, %s2385_s30 }
 0x137   : > { %1014 = vrot.lane.b32.xlu1 %v2946_v51, %s2385_s30 }
 0x138   : > { %v957_v17 = vpop.permute.xlu0 %956  ;;  %v959_v47 = vpop.permute.xlu1 %958 }
 0x139   : > { %v1109_v28 = vsel %vm1102_vm1, %v1068_v6, %v957_v17  ;;  %v1110_v14 = vsel %vm1102_vm1, %v1069_v0, %v959_v47 }
 0x13a   : > { %2097 = vmatprep.mubr.msk.f32.mxu0 %vm1153_vm2, %v1109_v28  ;;  %895 = vrot.lane.b32.xlu0 %v2936_v18, %s2384_s29 }
 0x13b   : > { %897 = vrot.lane.b32.xlu1 %v2946_v51, %s2384_s29  ;;  %2098 = vmatmul.mubr.msk.f32.gmra.mrb[6].mxu0 %vm1153_vm2, %v1110_v14 }
 0x13c   : > { %v840_v48 = vpop.permute.xlu0 %839  ;;  %v842_v36 = vpop.permute.xlu1 %841 }
 0x13d   : > { %v1070_v46 = vsel %vm1061_vm0, %v2622_v32, %v840_v48  ;;  %v1071_v24 = vsel %vm1061_vm0, %v2630_v43, %v842_v36  ;;  %v2386_v32 = vmov 0.0  }
 0x13e   : > { %1016 = vrot.lane.b32.xlu0 %v781_v27, %s2385_s30 }
 0x13f   : > { %1018 = vrot.lane.b32.xlu1 %v742_v29, %s2385_s30 }
 0x140   : > { %v961_v31 = vpop.permute.xlu0 %960  ;;  %v963_v38 = vpop.permute.xlu1 %962 }
 0x141   : > { %v1111_v35 = vsel %vm1102_vm1, %v1070_v46, %v961_v31  ;;  %v1112_v20 = vsel %vm1102_vm1, %v1071_v24, %v963_v38 }
 0x142   : > { %2100 = vmatprep.mubr.msk.f32.mxu0 %vm1153_vm2, %v1111_v35  ;;  %899 = vrot.lane.b32.xlu0 %v781_v27, %s2384_s29 }
 0x143   : > { %901 = vrot.lane.b32.xlu1 %v742_v29, %s2384_s29  ;;  %2101 = vmatmul.mubr.msk.f32.gmra.mrb[8].mxu0 %vm1153_vm2, %v1112_v20 }
 0x144   : > { %v844_v39 = vpop.permute.xlu0 %843  ;;  %v846_v52 = vpop.permute.xlu1 %845 }
 0x145   : > { %v1072_v54 = vsel %vm1061_vm0, %v2642_v56, %v844_v39  ;;  %v1073_v43 = vsel %vm1061_vm0, %v2650_v4, %v846_v52 }
 0x146   : > { %1020 = vrot.lane.b32.xlu0 %v2386_v32, %s2385_s30 }
 0x148   : > { %v965_v49 = vpop.permute.xlu0 %964  ;;  %v967_v2 = vpop.permute.xlu1 %966 }
 0x149   : > { %v1113_v62 = vsel %vm1102_vm1, %v1072_v54, %v965_v49  ;;  %v1114_v5 = vsel %vm1102_vm1, %v1073_v43, %v967_v2 }
 0x14a   : > { %2103 = vmatprep.mubr.msk.f32.mxu0 %vm1153_vm2, %v1113_v62 }
 0x14b   : > { %2104 = vmatmul.mubr.msk.f32.gmra.mrb[10].mxu0 %vm1153_vm2, %v1114_v5 }
 0x14c   : > { %v848_v53 = vpop.permute.xlu0 %847  ;;  %v850_v7 = vpop.permute.xlu1 %849 }
 0x14d   : > { %v1074_v37 = vsel %vm1061_vm0, %v2661_v12, %v848_v53  ;;  %v1075_v9 = vsel %vm1061_vm0, %v2670_v22, %v850_v7 }
 0x150   : > { %v969_v59 = vpop.permute.xlu0 %968  ;;  %v971_v10 = vpop.permute.xlu1 %970 }
 0x151   : > { %v1115_v56 = vsel %vm1102_vm1, %v1074_v37, %v969_v59  ;;  %v1116_v4 = vsel %vm1102_vm1, %v1075_v9, %v971_v10 }
 0x152   : > { %2106 = vmatprep.mubr.msk.f32.mxu0 %vm1153_vm2, %v1115_v56 }
 0x153   : > { %2107 = vmatmul.mubr.msk.f32.gmra.mrb[12].mxu0 %vm1153_vm2, %v1116_v4 }
 0x154   : > { %v852_v61 = vpop.permute.xlu0 %851  ;;  %v854_v13 = vpop.permute.xlu1 %853 }
 0x155   : > { %v1076_v6 = vsel %vm1061_vm0, %v2681_v33, %v852_v61  ;;  %v1077_v28 = vsel %vm1061_vm0, %v2690_v44, %v854_v13 }
 0x158   : > { %v973_v17 = vpop.permute.xlu0 %972  ;;  %v975_v29 = vpop.permute.xlu1 %974 }
 0x159   : > { %v1117_v12 = vsel %vm1102_vm1, %v1076_v6, %v973_v17  ;;  %v1118_v22 = vsel %vm1102_vm1, %v1077_v28, %v975_v29 }
 0x15a   : > { %2109 = vmatprep.mubr.msk.f32.mxu0 %vm1153_vm2, %v1117_v12 }
 0x15b   : > { %2110 = vmatmul.mubr.msk.f32.gmra.mrb[14].mxu0 %vm1153_vm2, %v1118_v22 }
 0x15c   : > { %v856_v0 = vpop.permute.xlu0 %855  ;;  %v858_v47 = vpop.permute.xlu1 %857 }
 0x15d   : > { %v1078_v48 = vsel %vm1061_vm0, %v2702_v63, %v856_v0  ;;  %v1079_v27 = vsel %vm1061_vm0, %v2710_v8, %v858_v47 }
 0x160   : > { %v977_v14 = vpop.permute.xlu0 %976  ;;  %v979_v36 = vpop.permute.xlu1 %978 }
 0x161   : > { %v1119_v33 = vsel %vm1102_vm1, %v1078_v48, %v977_v14  ;;  %v1120_v44 = vsel %vm1102_vm1, %v1079_v27, %v979_v36 }
 0x162   : > { %2112 = vmatprep.mubr.msk.f32.mxu0 %vm1153_vm2, %v1119_v33 }
 0x163   : > { %2113 = vmatmul.mubr.msk.f32.gmra.mrb[16].mxu0 %vm1153_vm2, %v1120_v44 }
 0x164   : > { %v860_v46 = vpop.permute.xlu0 %859  ;;  %v862_v31 = vpop.permute.xlu1 %861 }
 0x165   : > { %v1080_v35 = vsel %vm1061_vm0, %v2722_v23, %v860_v46  ;;  %v1081_v38 = vsel %vm1061_vm0, %v2730_v30, %v862_v31 }
 0x168   : > { %v981_v24 = vpop.permute.xlu0 %980  ;;  %v983_v39 = vpop.permute.xlu1 %982 }
 0x169   : > { %v1121_v63 = vsel %vm1102_vm1, %v1080_v35, %v981_v24  ;;  %v1122_v8 = vsel %vm1102_vm1, %v1081_v38, %v983_v39 }
 0x16a   : > { %2115 = vmatprep.mubr.msk.f32.mxu0 %vm1153_vm2, %v1121_v63 }
 0x16b   : > { %2116 = vmatmul.mubr.msk.f32.gmra.mrb[18].mxu0 %vm1153_vm2, %v1122_v8 }
 0x16c   : > { %v864_v20 = vpop.permute.xlu0 %863  ;;  %v866_v52 = vpop.permute.xlu1 %865 }
 0x16d   : > { %v1082_v54 = vsel %vm1061_vm0, %v2742_v50, %v864_v20  ;;  %v1083_v62 = vsel %vm1061_vm0, %v2750_v60, %v866_v52 }
 0x170   : > { %v985_v49 = vpop.permute.xlu0 %984  ;;  %v987_v43 = vpop.permute.xlu1 %986 }
 0x171   : > { %v1123_v23 = vsel %vm1102_vm1, %v1082_v54, %v985_v49  ;;  %v1124_v30 = vsel %vm1102_vm1, %v1083_v62, %v987_v43 }
 0x172   : > { %2118 = vmatprep.mubr.msk.f32.mxu0 %vm1153_vm2, %v1123_v23 }
 0x173   : > { %2119 = vmatmul.mubr.msk.f32.gmra.mrb[20].mxu0 %vm1153_vm2, %v1124_v30 }
 0x174   : > { %v868_v2 = vpop.permute.xlu0 %867  ;;  %v870_v53 = vpop.permute.xlu1 %869 }
 0x175   : > { %v1084_v5 = vsel %vm1061_vm0, %v2762_v15, %v868_v2  ;;  %v1085_v37 = vsel %vm1061_vm0, %v2770_v21, %v870_v53 }
 0x178   : > { %v989_v7 = vpop.permute.xlu0 %988  ;;  %v991_v59 = vpop.permute.xlu1 %990 }
 0x179   : > { %v1125_v50 = vsel %vm1102_vm1, %v1084_v5, %v989_v7  ;;  %v1126_v60 = vsel %vm1102_vm1, %v1085_v37, %v991_v59 }
 0x17a   : > { %2121 = vmatprep.mubr.msk.f32.mxu0 %vm1153_vm2, %v1125_v50 }
 0x17b   : > { %2122 = vmatmul.mubr.msk.f32.gmra.mrb[22].mxu0 %vm1153_vm2, %v1126_v60 }
 0x17c   : > { %v872_v56 = vpop.permute.xlu0 %871  ;;  %v874_v9 = vpop.permute.xlu1 %873 }
 0x17d   : > { %v1086_v10 = vsel %vm1061_vm0, %v2782_v40, %v872_v56  ;;  %v1087_v61 = vsel %vm1061_vm0, %v2790_v55, %v874_v9 }
 0x180   : > { %v993_v4 = vpop.permute.xlu0 %992  ;;  %v995_v13 = vpop.permute.xlu1 %994 }
 0x181   : > { %v1127_v15 = vsel %vm1102_vm1, %v1086_v10, %v993_v4  ;;  %v1128_v21 = vsel %vm1102_vm1, %v1087_v61, %v995_v13 }
 0x182   : > { %2124 = vmatprep.mubr.msk.f32.mxu0 %vm1153_vm2, %v1127_v15  ;;  %v1151_v15 = vsub.s32 4, %v2511_v42 }
 0x183   : > { %2125 = vmatmul.mubr.msk.f32.gmra.mrb[24].mxu0 %vm1153_vm2, %v1128_v21 }
 0x184   : > { %v876_v6 = vpop.permute.xlu0 %875  ;;  %v878_v17 = vpop.permute.xlu1 %877 }
 0x185   : > { %v1088_v12 = vsel %vm1061_vm0, %v2802_v11, %v876_v6  ;;  %v1089_v29 = vsel %vm1061_vm0, %v2810_v25, %v878_v17 }
 0x188   : > { %v997_v28 = vpop.permute.xlu0 %996  ;;  %v999_v22 = vpop.permute.xlu1 %998 }
 0x189   : > { %v1129_v40 = vsel %vm1102_vm1, %v1088_v12, %v997_v28  ;;  %v1130_v55 = vsel %vm1102_vm1, %v1089_v29, %v999_v22 }
 0x18a   : > { %2127 = vmatprep.mubr.msk.f32.mxu0 %vm1153_vm2, %v1129_v40 }
 0x18b   : > { %2128 = vmatmul.mubr.msk.f32.gmra.mrb[26].mxu0 %vm1153_vm2, %v1130_v55 }
 0x18c   : > { %v880_v0 = vpop.permute.xlu0 %879  ;;  %v882_v47 = vpop.permute.xlu1 %881 }
 0x18d   : > { %v1090_v48 = vsel %vm1061_vm0, %v2822_v41, %v880_v0  ;;  %v1091_v33 = vsel %vm1061_vm0, %v2830_v58, %v882_v47 }
 0x190   : > { %v1001_v14 = vpop.permute.xlu0 %1000  ;;  %v1003_v27 = vpop.permute.xlu1 %1002 }
 0x191   : > { %v1131_v11 = vsel %vm1102_vm1, %v1090_v48, %v1001_v14  ;;  %v1132_v25 = vsel %vm1102_vm1, %v1091_v33, %v1003_v27 }
 0x192   : > { %2130 = vmatprep.mubr.msk.f32.mxu0 %vm1153_vm2, %v1131_v11 }
 0x193   : > { %2131 = vmatmul.mubr.msk.f32.gmra.mrb[28].mxu0 %vm1153_vm2, %v1132_v25 }
 0x194   : > { %v884_v36 = vpop.permute.xlu0 %883 }
 0x195   : > { %v886_v44 = vpop.permute.xlu1 %885  ;;  %v1092_v46 = vsel %vm1061_vm0, %v2843_v26, %v884_v36 }
 0x196   : > { %v1093_v35 = vsel %vm1061_vm0, %v2851_v34, %v886_v44 }
 0x198   : > { %v1005_v31 = vpop.permute.xlu0 %1004 }
 0x199   : > { %v1133_v41 = vsel %vm1102_vm1, %v1092_v46, %v1005_v31  ;;  %v1007_v24 = vpop.permute.xlu1 %1006 }
 0x19a   : > { %2133 = vmatprep.mubr.msk.f32.mxu0 %vm1153_vm2, %v1133_v41  ;;  %v1134_v58 = vsel %vm1102_vm1, %v1093_v35, %v1007_v24 }
 0x19b   : > { %2134 = vmatmul.mubr.msk.f32.gmra.mrb[30].mxu0 %vm1153_vm2, %v1134_v58 }
 0x19c   : > { %v888_v63 = vpop.permute.xlu0 %887 }
 0x19d   : > { %v890_v38 = vpop.permute.xlu1 %889  ;;  %v1094_v39 = vsel %vm1061_vm0, %v2863_v3, %v888_v63 }
 0x19e   : > { %v1095_v20 = vsel %vm1061_vm0, %v2872_v19, %v890_v38 }
 0x1a0   : > { %v1009_v8 = vpop.permute.xlu0 %1008 }
 0x1a1   : > { %v1135_v26 = vsel %vm1102_vm1, %v1094_v39, %v1009_v8  ;;  %v1011_v52 = vpop.permute.xlu1 %1010 }
 0x1a2   : > { %2136 = vmatprep.mubr.msk.f32.mxu0 %vm1153_vm2, %v1135_v26  ;;  %v1136_v34 = vsel %vm1102_vm1, %v1095_v20, %v1011_v52 }
 0x1a3   : > { %2137 = vmatmul.mubr.msk.f32.gmra.mrb[32].mxu0 %vm1153_vm2, %v1136_v34 }
 0x1a4   : > { %v892_v54 = vpop.permute.xlu0 %891 }
 0x1a5   : > { %v894_v49 = vpop.permute.xlu1 %893  ;;  %v1096_v23 = vsel %vm1061_vm0, %v2888_v1, %v892_v54 }
 0x1a6   : > { %v1097_v43 = vsel %vm1061_vm0, %v2900_v16, %v894_v49 }
 0x1a8   : > { %v1013_v62 = vpop.permute.xlu0 %1012 }
 0x1a9   : > { %v1137_v3 = vsel %vm1102_vm1, %v1096_v23, %v1013_v62  ;;  %v1015_v30 = vpop.permute.xlu1 %1014 }
 0x1aa   : > { %2139 = vmatprep.mubr.msk.f32.mxu0 %vm1153_vm2, %v1137_v3  ;;  %v1138_v19 = vsel %vm1102_vm1, %v1097_v43, %v1015_v30 }
 0x1ab   : > { %2140 = vmatmul.mubr.msk.f32.gmra.mrb[34].mxu0 %vm1153_vm2, %v1138_v19 }
 0x1ac   : > { %v896_v2 = vpop.permute.xlu0 %895 }
 0x1ad   : > { %v898_v53 = vpop.permute.xlu1 %897  ;;  %v1098_v5 = vsel %vm1061_vm0, %v2915_v45, %v896_v2 }
 0x1ae   : > { %v1099_v50 = vsel %vm1061_vm0, %v2925_v57, %v898_v53 }
 0x1b0   : > { %v1017_v7 = vpop.permute.xlu0 %1016 }
 0x1b1   : > { %v1139_v1 = vsel %vm1102_vm1, %v1098_v5, %v1017_v7  ;;  %v1019_v37 = vpop.permute.xlu1 %1018  ;;  %v1602_v7 = vld [vmem:[%s3356_s2 + $0x80] sm:$0xff] }
 0x1b2   : > { %2142 = vmatprep.mubr.msk.f32.mxu0 %vm1153_vm2, %v1139_v1  ;;  %v1140_v16 = vsel %vm1102_vm1, %v1099_v50, %v1019_v37  ;;  %v1603_v1 = vld [vmem:[%s3356_s2 + $0x88] sm:$0xff]  ;;  %v1586_v50 = vld [vmem:[%s3356_s2] sm:$0xff] }
 0x1b3   : > { %2143 = vmatmul.mubr.msk.f32.gmra.mrb[36].mxu0 %vm1153_vm2, %v1140_v16  ;;  %v2198_v37 = vpack.c.bf16 %v1603_v1, %v1602_v7  ;;  %v1587_v16 = vld [vmem:[%s3356_s2 + $0x8] sm:$0xff]  ;;  %v1598_v7 = vld [vmem:[%s3356_s2 + $0x60] sm:$0xff] }
 0x1b4   : > { %v900_v59 = vpop.permute.xlu0 %899  ;;  %v1599_v1 = vld [vmem:[%s3356_s2 + $0x68] sm:$0xff] }
 0x1b5   : > { %v902_v60 = vpop.permute.xlu1 %901  ;;  %v1100_v45 = vsel %vm1061_vm0, %v2936_v18, %v900_v59  ;;  %v1604_v59 = vld [vmem:[%s3356_s2 + $0x90] sm:$0xff]  ;;  %2199 = vmatprep.subr.bf16.mxu1 %v2198_v37 }
 0x1b6   : > { %v1101_v56 = vsel %vm1061_vm0, %v2946_v51, %v902_v60  ;;  %v3098_v51 = vld [vmem:[%s3357_s3] sm:$0xff]  ;;  %v1605_v60 = vld [vmem:[%s3356_s2 + $0x98] sm:$0xff] }
 0x1b7   : > { %v3101_v18 = vrot.slane %v3098_v51, %v1151_v15 }
 0x1b8   : > { %v1021_v9 = vpop.permute.xlu0 %1020 }
 0x1b9   : > { %v1141_v10 = vsel %vm1102_vm1, %v1100_v45, %v1021_v9  ;;  %v1142_v4 = vsel %vm1102_vm1, %v1101_v56, %v1021_v9  ;;  %v2200_v56 = vpack.c.bf16 %v1587_v16, %v1586_v50  ;;  %v2202_v45 = vpack.c.bf16 %v1605_v60, %v1604_v59  ;;  %v1588_v9 = vld [vmem:[%s3356_s2 + $0x10] sm:$0xff] }
 0x1ba   : > { %2145 = vmatprep.mubr.msk.f32.mxu0 %vm1153_vm2, %v1141_v10  ;;  %v1589_v10 = vld [vmem:[%s3356_s2 + $0x18] sm:$0xff]  ;;  %v2224_v59 = vpack.c.bf16 %v1599_v1, %v1598_v7  ;;  %v1616_v60 = vld [vmem:[%s3356_s2 + $0xf0] sm:$0xff]  ;;  %v1623_v7 = vld [vmem:[%s3356_s2 + $0x128] sm:$0xff] }
 0x1bb   : > { %2146 = vmatmul.mubr.msk.f32.gmra.mrb[38].mxu0 %vm1153_vm2, %v1142_v4  ;;  %v1606_v4 = vld [vmem:[%s3356_s2 + $0xa0] sm:$0xff]  ;;  %2201 = vmatpush3.bf16.msra.mxu1 %v2200_v56  ;;  %v1617_v56 = vld [vmem:[%s3356_s2 + $0xf8] sm:$0xff] }
 0x1bc   : > { %2203 = vmatprep.subr.bf16.mxu1 %v2202_v45  ;;  %v2226_v45 = vpack.c.bf16 %v1617_v56, %v1616_v60  ;;  %v199_v56 = vld [vmem:[%s3357_s3 + $0x8] sm:$0xff] }
 0x1f6   : > { %v2090_v57 = vpop.f32.mrb[0].mxu0 }
 0x1f7   : > { %v1340_v61 = vpop.f32.mrb[1].mxu0 }
 0x1f8   : > { %v1341_v13 = vadd.f32 %v1340_v61, %v3101_v18  ;;  %v1607_v61 = vld [vmem:[%s3356_s2 + $0xa8] sm:$0xff] }
 0x1fa   : > { %v1519_v12 = vmax.f32 %v1341_v13, 0.0 }
 0x1fe   : > { %v2093_v21 = vpop.f32.mrb[2].mxu0 }
 0x1ff   : > { %v1349_v6 = vpop.f32.mrb[3].mxu0  ;;  %v2204_v21 = vpack.c.bf16 %v1589_v10, %v1588_v9  ;;  %v1601_v9 = vld [vmem:[%s3356_s2 + $0x78] sm:$0xff] }
 0x200   : > { %v1350_v17 = vadd.f32 %v1349_v6, %v3101_v18 }
 0x201   : > { %2205 = vmatpush3.bf16.msra.mxu1 %v2204_v21 }
 0x202   : > { %v1520_v28 = vmax.f32 %v1350_v17, 0.0  ;;  %v2206_v17 = vpack.c.bf16 %v1607_v61, %v1606_v4 }
 0x204   : > { %v3105_v40 = vadd.f32 %v1520_v28, %v1519_v12  ;;  %v1590_v12 = vld [vmem:[%s3356_s2 + $0x20] sm:$0xff]  ;;  %v1591_v28 = vld [vmem:[%s3356_s2 + $0x28] sm:$0xff]  ;;  %2207 = vmatprep.subr.bf16.mxu1 %v2206_v17 }
 0x206   : > { %v2096_v29 = vpop.f32.mrb[4].mxu0 }
 0x207   : > { %v1358_v22 = vpop.f32.mrb[5].mxu0 }
 0x208   : > { %v1359_v55 = vadd.f32 %v1358_v22, %v3101_v18 }
 0x20a   : > { %v1521_v14 = vmax.f32 %v1359_v55, 0.0  ;;  %v2208_v55 = vpack.c.bf16 %v1591_v28, %v1590_v12 }
 0x20c   : > { %2209 = vmatpush3.bf16.msra.mxu1 %v2208_v55 }
 0x20e   : > { %v2099_v0 = vpop.f32.mrb[6].mxu0 }
 0x20f   : > { %v1367_v47 = vpop.f32.mrb[7].mxu0 }
 0x210   : > { %v1368_v48 = vadd.f32 %v1367_v47, %v3101_v18 }
 0x212   : > { %v1522_v11 = vmax.f32 %v1368_v48, 0.0 }
 0x214   : > { %v3109_v33 = vadd.f32 %v1522_v11, %v1521_v14  ;;  %v1608_v11 = vld [vmem:[%s3356_s2 + $0xb0] sm:$0xff] }
 0x216   : > { %v2102_v27 = vpop.f32.mrb[8].mxu0 }
 0x217   : > { %v1376_v25 = vpop.f32.mrb[9].mxu0  ;;  %v1609_v27 = vld [vmem:[%s3356_s2 + $0xb8] sm:$0xff] }
 0x218   : > { %v1377_v36 = vadd.f32 %v1376_v25, %v3101_v18  ;;  %v1592_v25 = vld [vmem:[%s3356_s2 + $0x30] sm:$0xff] }
 0x21a   : > { %v1523_v41 = vmax.f32 %v1377_v36, 0.0  ;;  %v2210_v36 = vpack.c.bf16 %v1609_v27, %v1608_v11 }
 0x21c   : > { %2211 = vmatprep.subr.bf16.mxu1 %v2210_v36 }
 0x21e   : > { %v2105_v44 = vpop.f32.mrb[10].mxu0 }
 0x21f   : > { %v1385_v46 = vpop.f32.mrb[11].mxu0  ;;  %v1610_v44 = vld [vmem:[%s3356_s2 + $0xc0] sm:$0xff] }
 0x220   : > { %v1386_v31 = vadd.f32 %v1385_v46, %v3101_v18  ;;  %v1611_v46 = vld [vmem:[%s3356_s2 + $0xc8] sm:$0xff] }
 0x222   : > { %v1524_v35 = vmax.f32 %v1386_v31, 0.0 }
 0x224   : > { %v3113_v24 = vadd.f32 %v1524_v35, %v1523_v41  ;;  %v2214_v41 = vpack.c.bf16 %v1611_v46, %v1610_v44  ;;  %v1594_v35 = vld [vmem:[%s3356_s2 + $0x40] sm:$0xff] }
 0x226   : > { %v2108_v58 = vpop.f32.mrb[12].mxu0 }
 0x227   : > { %v1394_v63 = vpop.f32.mrb[13].mxu0  ;;  %v1595_v58 = vld [vmem:[%s3356_s2 + $0x48] sm:$0xff] }
 0x228   : > { %v1395_v38 = vadd.f32 %v1394_v63, %v3101_v18  ;;  %v1612_v63 = vld [vmem:[%s3356_s2 + $0xd0] sm:$0xff] }
 0x22a   : > { %v1525_v20 = vmax.f32 %v1395_v38, 0.0 }
 0x22e   : > { %v2111_v39 = vpop.f32.mrb[14].mxu0 }
 0x22f   : > { %v1403_v8 = vpop.f32.mrb[15].mxu0 }
 0x230   : > { %v1404_v26 = vadd.f32 %v1403_v8, %v3101_v18  ;;  %v1613_v8 = vld [vmem:[%s3356_s2 + $0xd8] sm:$0xff] }
 0x232   : > { %v1526_v52 = vmax.f32 %v1404_v26, 0.0 }
 0x234   : > { %v3117_v34 = vadd.f32 %v1526_v52, %v1525_v20  ;;  %v2216_v20 = vpack.c.bf16 %v1595_v58, %v1594_v35 }
 0x236   : > { %v2114_v54 = vpop.f32.mrb[16].mxu0 }
 0x237   : > { %v1412_v49 = vpop.f32.mrb[17].mxu0  ;;  %v2218_v54 = vpack.c.bf16 %v1613_v8, %v1612_v63 }
 0x238   : > { %v1413_v23 = vadd.f32 %v1412_v49, %v3101_v18  ;;  %v1596_v49 = vld [vmem:[%s3356_s2 + $0x50] sm:$0xff] }
 0x23a   : > { %v1527_v30 = vmax.f32 %v1413_v23, 0.0  ;;  %v1597_v23 = vld [vmem:[%s3356_s2 + $0x58] sm:$0xff] }
 0x23e   : > { %v2117_v62 = vpop.f32.mrb[18].mxu0 }
 0x23f   : > { %v1421_v3 = vpop.f32.mrb[19].mxu0  ;;  %v1614_v62 = vld [vmem:[%s3356_s2 + $0xe0] sm:$0xff] }
 0x240   : > { %v1422_v43 = vadd.f32 %v1421_v3, %v3101_v18  ;;  %v1615_v3 = vld [vmem:[%s3356_s2 + $0xe8] sm:$0xff] }
 0x242   : > { %v1528_v19 = vmax.f32 %v1422_v43, 0.0 }
 0x244   : > { %v3121_v2 = vadd.f32 %v1528_v19, %v1527_v30  ;;  %v2220_v19 = vpack.c.bf16 %v1597_v23, %v1596_v49 }
 0x246   : > { %v2120_v53 = vpop.f32.mrb[20].mxu0 }
 0x247   : > { %v1430_v5 = vpop.f32.mrb[21].mxu0 }
 0x248   : > { %v1431_v57 = vadd.f32 %v1430_v5, %v3101_v18  ;;  %v2222_v5 = vpack.c.bf16 %v1615_v3, %v1614_v62 }
 0x24a   : > { %v1529_v29 = vmax.f32 %v1431_v57, 0.0 }
 0x24e   : > { %v2123_v15 = vpop.f32.mrb[22].mxu0 }
 0x24f   : > { %v1439_v13 = vpop.f32.mrb[23].mxu0 }
 0x250   : > { %v1440_v6 = vadd.f32 %v1439_v13, %v3101_v18  ;;  %v2388_v13 = vmov 0.0|0.0  }
 0x252   : > { %v1530_v22 = vmax.f32 %v1440_v6, 0.0 }
 0x254   : > { %v1544_v0 = vadd.f32 %v1530_v22, %v1529_v29 }
 0x256   : > { %v2303_v47 = vpack.i.bf16 %v3109_v33, %v1544_v0  ;;  %v2126_v48 = vpop.f32.mrb[24].mxu0  ;;  %v1593_v33 = vld [vmem:[%s3356_s2 + $0x38] sm:$0xff] }
 0x257   : > { %v1448_v14 = vpop.f32.mrb[25].mxu0  ;;  %v2212_v31 = vpack.c.bf16 %v1593_v33, %v1592_v25 }
 0x258   : > { %2304 = vrot.lane.b32.xlu1 %v2303_v47, %s2385_s30  ;;  %v1449_v38 = vadd.f32 %v1448_v14, %v3101_v18 }
 0x259   : > { %2213 = vmatpush3.bf16.msra.mxu1 %v2212_v31 }
 0x25a   : > { %2215 = vmatprep.subr.bf16.mxu1 %v2214_v41  ;;  %v1531_v43 = vmax.f32 %v1449_v38, 0.0 }
 0x25d   : > { %2217 = vmatpush3.bf16.msra.mxu1 %v2216_v20 }
 0x25e   : > { %v2129_v39 = vpop.f32.mrb[26].mxu0  ;;  %2219 = vmatprep.subr.bf16.mxu1 %v2218_v54 }
 0x25f   : > { %v1457_v26 = vpop.f32.mrb[27].mxu0 }
 0x260   : > { %v1458_v52 = vadd.f32 %v1457_v26, %v3101_v18  ;;  %v1618_v26 = vld [vmem:[%s3356_s2 + $0x100] sm:$0xff] }
 0x261   : > { %2221 = vmatpush3.bf16.msra.mxu1 %v2220_v19 }
 0x262   : > { %v1532_v30 = vmax.f32 %v1458_v52, 0.0  ;;  %2223 = vmatprep.subr.bf16.mxu1 %v2222_v5  ;;  %v1621_v5 = vld [vmem:[%s3356_s2 + $0x118] sm:$0xff] }
 0x264   : > { %v1545_v53 = vadd.f32 %v1532_v30, %v1531_v43 }
 0x265   : > { %2225 = vmatpush3.bf16.msra.mxu1 %v2224_v59 }
 0x266   : > { %v2308_v50 = vpack.i.bf16 %v3113_v24, %v1545_v53  ;;  %v2132_v37 = vpop.f32.mrb[28].mxu0  ;;  %v1600_v24 = vld [vmem:[%s3356_s2 + $0x70] sm:$0xff]  ;;  %2227 = vmatprep.subr.bf16.mxu1 %v2226_v45  ;;  %v201_v45 = vld [vmem:[%s3357_s3 + $0x18] sm:$0xff] }
 0x267   : > { %v1466_v16 = vpop.f32.mrb[29].mxu0  ;;  %v2228_v10 = vpack.c.bf16 %v1601_v9, %v1600_v24  ;;  %v1620_v53 = vld [vmem:[%s3356_s2 + $0x110] sm:$0xff]  ;;  %v1625_v37 = vld [vmem:[%s3356_s2 + $0x138] sm:$0xff] }
 0x268   : > { %2309 = vrot.lane.b32.xlu0 %v2308_v50, %s2387_s20  ;;  %v1467_v4 = vadd.f32 %v1466_v16, %v3101_v18  ;;  %v1624_v50 = vld [vmem:[%s3356_s2 + $0x130] sm:$0xff] }
 0x269   : > { %2229 = vmatpush3.bf16.msra.mxu1 %v2228_v10  ;;  %v2240_v16 = vpack.c.bf16 %v1625_v37, %v1624_v50  ;;  %v200_v24 = vld [vmem:[%s3357_s3 + $0x10] sm:$0xff]  ;;  %v202_v10 = vld [vmem:[%s3357_s3 + $0x20] sm:$0xff] }
 0x26a   : > { %2230 = vmatprep.subr.bf16.mxu1 %v2388_v13  ;;  %v1533_v21 = vmax.f32 %v1467_v4, 0.0  ;;  %v2243_v9 = vpack.c.bf16 %v200_v24, %v199_v56  ;;  %v2246_v4 = vpack.c.bf16 %v202_v10, %v201_v45 }
 0x26e   : > { %v2135_v57 = vpop.f32.mrb[30].mxu0 }
 0x26f   : > { %v1475_v15 = vpop.f32.mrb[31].mxu0  ;;  %v204_v57 = vld [vmem:[%s3357_s3 + $0x30] sm:$0xff] }
 0x270   : > { %v1476_v61 = vadd.f32 %v1475_v15, %v3101_v18 }
 0x272   : > { %v1534_v6 = vmax.f32 %v1476_v61, 0.0  ;;  %v205_v61 = vld [vmem:[%s3357_s3 + $0x38] sm:$0xff] }
 0x274   : > { %v1546_v17 = vadd.f32 %v1534_v6, %v1533_v21  ;;  %v206_v21 = vld [vmem:[%s3357_s3 + $0x40] sm:$0xff] }
 0x275   : > { %v2252_v6 = vpack.c.bf16 %v206_v21, %v205_v61 }
 0x276   : > { %v2313_v12 = vpack.i.bf16 %v3117_v34, %v1546_v17  ;;  %v2138_v28 = vpop.f32.mrb[32].mxu0 }
 0x277   : > { %v1484_v29 = vpop.f32.mrb[33].mxu0 }
 0x278   : > { %2314 = vrot.lane.b32.xlu1 %v2313_v12, %s2389_s8  ;;  %v1485_v22 = vadd.f32 %v1484_v29, %v3101_v18  ;;  %v1628_v29 = vsub.s32 5, %v2511_v42  ;;  %s1929_s8 = sshll.u32 %s189_s7, 3 }
 0x279   : > { %s191_s10 = scalar_lea.vmem [#allocation2], %s1929_s8 }
 0x27a   : > { %v1535_v48 = vmax.f32 %v1485_v22, 0.0  ;;  %v1629_v22 = vrot.slane %v3098_v51, %v1628_v29  ;;  %s1866_s11 = sshll.u32 %s191_s10, 4  ;;  %s3314_s11 = int_to_ptr.vmem [resolvable:$true] %s1866_s11 }
 0x27b   : > { %s2319_s20 = scalar_lea.vmem %s3314_s11, 128  ;;  %p2326_p0 = scmp.lt.s32.totalorder %s3314_s11, %s2324_s22 }
 0x27c   : > { %p2320_p11 = scmp.ne.s32.totalorder %s3314_s11, %s2319_s20  ;;  %p2327_p1 = scmp.lt.s32.totalorder %s2325_s23, %s2319_s20 }
 0x27e   : > { %v2141_v55 = vpop.f32.mrb[34].mxu0  ;;  %p2321_p12 = pnand %p2320_p11, %p2455_p5  ;;  %p2328_p2 = por %p2327_p1, %p2326_p0 }
 0x27f   : > { %v1493_v0 = vpop.f32.mrb[35].mxu0 }
 0x280   : > { %v1494_v47 = vadd.f32 %v1493_v0, %v3101_v18  ;;  %p2322_p13 = pneg %p2321_p12 }
 0x282   : > { %v1536_v14 = vmax.f32 %v1494_v47, 0.0  ;;  %p2329_p3 = pnand %p2328_p2, %p2322_p13 }
 0x284   : > { %v1547_v11 = vadd.f32 %v1536_v14, %v1535_v48  ;;  %v1776_v14 = vsub.s32 6, %v2511_v42 }
 0x286   : > { %v2144_v27 = vpop.f32.mrb[36].mxu0 }
 0x287   : > { %v1502_v25 = vpop.f32.mrb[37].mxu0 }
 0x288   : > { %v1503_v36 = vadd.f32 %v1502_v25, %v3101_v18 }
 0x28a   : > { %v1537_v46 = vmax.f32 %v1503_v36, 0.0 }
 0x28e   : > { %v2147_v33 = vpop.f32.mrb[38].mxu0 }
 0x28f   : > { %v1511_v44 = vpop.f32.mrb[39].mxu0 }
 0x290   : > { %v1512_v34 = vadd.f32 %v1511_v44, %v3101_v18  ;;  %v1619_v18 = vld [vmem:[%s3356_s2 + $0x108] sm:$0xff] }
 0x291   : > { %v2231_v43 = vpack.c.bf16 %v1619_v18, %v1618_v26 }
 0x292   : > { %v1538_v31 = vmax.f32 %v1512_v34, 0.0 }
 0x294   : > { %v1548_v41 = vadd.f32 %v1538_v31, %v1537_v46 }
 0x296   : > { %1574 = vrot.lane.b32.xlu0 %v1548_v41, %s2385_s30 }
 0x2ca   : > { %v2305_v35 = vpop.permute.xlu1 %2304 }
 0x2cb   : > { %v2307_v63 = vunpack.i.h.bf16 %v2305_v35  ;;  %v2306_v38 = vunpack.i.l.bf16 %v2305_v35 }
 0x2cd   : > { %v1582_v49 = vsel %vm1102_vm1, %v3121_v2, %v2306_v38  ;;  %v1577_v23 = vsel %vm1102_vm1, %v3105_v40, %v2307_v63  ;;  %v2234_v2 = vpack.c.bf16 %v1621_v5, %v1620_v53  ;;  %v1622_v40 = vld [vmem:[%s3356_s2 + $0x120] sm:$0xff] }
 0x2ce   : > { %v2237_v1 = vpack.c.bf16 %v1623_v7, %v1622_v40 }
 0x2da   : > { %v2310_v58 = vpop.permute.xlu0 %2309 }
 0x2db   : > { %v2312_v39 = vunpack.i.h.bf16 %v2310_v58  ;;  %v2311_v8 = vunpack.i.l.bf16 %v2310_v58 }
 0x2dd   : > { %v1583_v62 = vsel %vm1578_vm3, %v1582_v49, %v2311_v8  ;;  %v1579_v3 = vsel %vm1578_vm3, %v1577_v23, %v2312_v39 }
 0x2ea   : > { %v2315_v20 = vpop.permute.xlu1 %2314 }
 0x2eb   : > { %v2317_v52 = vunpack.i.h.bf16 %v2315_v20  ;;  %v2316_v54 = vunpack.i.l.bf16 %v2315_v20 }
 0x2ed   : > { %v1584_v30 = vsel %vm1580_vm4, %v1583_v62, %v2316_v54  ;;  %v1581_v19 = vsel %vm1580_vm4, %v1579_v3, %v2317_v52 }
 0x2ee   : > { %1697 = vmatprep.mubr.f32.mxu1 %v1584_v30 }
 0x2ef   : > { %1698 = vmatmul.mubr.f32.vlgmr.msra.gmra.mrb[0].mxu1 %v1581_v19 }
 0x2f0   : > { %2232 = vmatpush3.bf16.msra.mxu1 %v2231_v43  ;;  %2164 = vmatprep.mubr.msk.f32.mxu1 %vm2390_vm5, %v2386_v32 }
 0x2f1   : > { %2233 = vmatprep.subr.bf16.mxu1 %v2388_v13 }
 0x2f4   : > { %2235 = vmatpush3.bf16.msra.mxu1 %v2234_v2 }
 0x2f5   : > { %2236 = vmatprep.subr.bf16.mxu1 %v2388_v13 }
 0x2f8   : > { %2238 = vmatpush3.bf16.msra.mxu1 %v2237_v1 }
 0x2f9   : > { %2239 = vmatprep.subr.bf16.mxu1 %v2388_v13 }
 0x2fc   : > { %2241 = vmatpush3.bf16.msra.mxu1 %v2240_v16 }
 0x2fd   : > { %2242 = vmatprep.subr.bf16.mxu1 %v2388_v13 }
 0x308   : > { %v1575_v59 = vpop.permute.xlu0 %1574 }
 0x309   : > { %v1585_v60 = vsel %vm1102_vm1, %v1547_v11, %v1575_v59  ;;  %v1777_v11 = vrot.slane %v3098_v51, %v1776_v14 }
 0x30a   : > { %2165 = vmatmul.mubr.msk.f32.vlgmr.msra.gmra.mrb[2].mxu1 %vm1578_vm3, %v1585_v60 }
 0x30b   : > { %2183 = vmatprep.mubr.msk.f32.mxu1 %vm2390_vm5, %v2386_v32  ;;  %2244 = vmatpush3.bf16.msra.mxu1 %v2243_v9  ;;  %v203_v32 = vld [vmem:[%s3357_s3 + $0x28] sm:$0xff] }
 0x30c   : > { %2245 = vmatprep.subr.bf16.mxu1 %v2388_v13  ;;  %v2249_v15 = vpack.c.bf16 %v204_v57, %v203_v32 }
 0x30f   : > { %2247 = vmatpush3.bf16.msra.mxu1 %v2246_v4 }
 0x310   : > { %2248 = vmatprep.subr.bf16.mxu1 %v2388_v13 }
 0x313   : > { %2250 = vmatpush3.bf16.msra.mxu1 %v2249_v15 }
 0x314   : > { %2251 = vmatprep.subr.bf16.mxu1 %v2388_v13 }
 0x317   : > { %2253 = vmatpush3.bf16.msra.mxu1 %v2252_v6 }
 0x3c2   : > { %v2055_v17 = vpop.f32.mrb[0].mxu1 }
 0x3c3   : > { %v2056_v12 = vpop.f32.mrb[1].mxu1 }
 0x3c4   : > { %v2057_v28 = vadd.f32 %v2056_v12, %v2055_v17 }
 0x3c6   : > { %v1700_v13 = vadd.f32 %v2057_v28, %v1629_v22 }
 0x3dd   : > { %v1769_v55 = vpop.f32.mrb[2].mxu1 }
 0x3de   : > { %v1770_v0 = vadd.f32 %v1769_v55, %v1700_v13  ;;  %v2166_v47 = vpop.f32.mrb[3].mxu1 }
 0x3e0   : > { %v1773_v48 = vmax.f32 %v1770_v0, 0.0 }
 0x3e2   : > { %2184 = vmatmul.mubr.msk.f32.vlgmr.msra.gmra.mrb[4].mxu1 %vm1578_vm3, %v1773_v48 }
 0x4b5   : > { %v1847_v27 = vpop.f32.mrb[4].mxu1 }
 0x4b6   : > { %v1848_v25 = vadd.f32 %v1847_v27, %v1777_v11  ;;  %v2185_v36 = vpop.f32.mrb[5].mxu1 }
 0x4b8   : > { %1851 = vst [vmem:[%s191_s10] sm:$0xff] %v1848_v25 }
 0x4b9   : > { %2332 = shalt.err (!%p2329_p3)
}
 0x4ba   : > { %s2333_s27 = scalar_lea.hbm %s3312_s13, 128  ;;  %s2337_s5 = scalar_lea.hbm %s3358_s4, 256 }
 0x4bb   : > { %p2334_p4 = scmp.ne.s32.totalorder %s3312_s13, %s2333_s27  ;;  %p2338_p9 = scmp.lt.u32.totalorder %s3312_s13, %s3358_s4 }
 0x4bc   : > { %p2339_p10 = scmp.lt.u32.totalorder %s2337_s5, %s2333_s27  ;;  %p2341_p12 = scmp.lt.u32.totalorder %s2333_s27, %s3312_s13 }
 0x4bd   : > { %p2335_p7 = pnand %p2334_p4, %p2455_p5 }
 0x4be   : > { %p2340_p11 = por %p2339_p10, %p2338_p9 }
 0x4bf   : > { %p2336_p8 = pneg %p2335_p7 }
 0x4c0   : > { %p2342_p13 = por %p2341_p12, %p2340_p11 }
 0x4c2   : > { %p2343_p0 = pnand %p2342_p13, %p2336_p8 }
 0x4c4   : > { %2346 = shalt.err (!%p2343_p0)
}
 0x4c5   : > { %2254 = dma.vmem_to_hbm [thread:$0]  (%p2455_p5), %s3314_s11, 128, %s3312_s13, %s1853_s14  }
 0x4c6 PF: > { %p2260_p1 = scmp.ge.s32.totalorder %s2381_s18, 2  ;;  %s1878_s8 = sand.u32 1, %s2369_s15  }
 0x4c7   : > { %s1879_s9 = scalar_lea.sflag [#allocation3], %s1878_s8 }
 0x4c8   : > { %p2257_p2 = pnand %p2260_p1, %p2459_p6 }
 0x4ca   : > { %2364 = dma.done.wait (!%p2257_p2), %s1879_s9, 128  }
 0x4cb   : > { %2366 = vsyncadd (!%p2257_p2), %s1879_s9, 4294967168  ;;  %p14_p3 = scmp.ge.s32.totalorder %s2442_s21, 4   ;;  %s3361_s15 = smov %s2373_s16 }
 0x4cc   : > { %s3362_s16 = smov %s2377_s17  ;;  %s3363_s17 = smov %s2453_s24 }
 0x4cd   : > { %s3364_s18 = smov %s2442_s21  ;;  %16 = sbr.rel (!%p14_p3) target bundleno = 3 (0x3), region = 71 }
 0x4d4   :  { %1884 = vsyncpa [#allocation3], 1 }
 0x4d5   :  { %1886 = vsyncpa [#allocation3 + $0x1], 1 }

</bundles_post_ra>
